<compile_context>
chip_gen: v6e
topology: v6e:2x2x1
jax: 0.10.0
libtpu: 0.0.40
codegen_flags: <defaults>
</compile_context>

<pallas_src>
import functools

import jax
import jax.numpy as jnp
from jax import lax
from jax.experimental import pallas as pl
from jax.experimental.pallas import tpu as pltpu


# ----------------------------- config (small) ------------------------------
VOCAB = 64
HIDDEN = 128
NUM_HEADS = 4
HEAD_DIM = HIDDEN // NUM_HEADS          # 32
NUM_VIRTUAL_TOKENS = 4                  # config_peft.layer_num_virtual_tokens
BATCH = 2
SEQ = 8
VOCAB_PAD = ((VOCAB + 127) // 128) * 128   # 128: lane-dense logits output


# ------------------------------ fused Pallas kernel ------------------------------
def _fused_lm_kernel(has_prefix, prefix_len, vlen_ref, x_ref, *rest):
    """One batch-block per grid step: embed-in -> QKV -> prefix/causal attention
    -> out proj (+residual) -> padded LM-head logits, all resident in VMEM."""
    if has_prefix:
        kp_ref, vp_ref, wqkv_ref, wo_ref, wlm_ref, out_ref = rest
    else:
        wqkv_ref, wo_ref, wlm_ref, out_ref = rest
        kp_ref = vp_ref = None

    bb, S, D = x_ref.shape
    H, Dh = NUM_HEADS, HEAD_DIM
    P_pad = kp_ref.shape[1] if has_prefix else 0
    T = P_pad + S
    VPAD = wlm_ref.shape[1]
    scale = 1.0 / float(Dh) ** 0.5
    b0 = pl.program_id(0) * bb                        # first batch row in this block

    x = x_ref[...]                                    # (bb, S, D) bf16
    x2 = x.reshape(bb * S, D)                         # fold batch into matmul M dim

    # Fused QKV matmul for the whole block (bf16 MXU inputs, f32 accumulate).
    qkv = jnp.dot(x2, wqkv_ref[...], preferred_element_type=jnp.float32)  # (bb*S, 3D)
    q_all = (qkv[:, 0 * D:1 * D] * scale).astype(jnp.bfloat16)  # scale folded into q
    k_all = qkv[:, 1 * D:2 * D].astype(jnp.bfloat16)
    v_all = qkv[:, 2 * D:3 * D].astype(jnp.bfloat16)

    kp = kp_ref[...] if has_prefix else None          # (bb, P_pad, D) bf16 lane-dense
    vp = vp_ref[...] if has_prefix else None

    hidden_rows = []
    for i in range(bb):                               # static unroll (bb is tiny)
        r0 = i * S
        q_i = q_all[r0:r0 + S]                        # (S, D)
        k_i = k_all[r0:r0 + S]
        v_i = v_all[r0:r0 + S]
        if has_prefix:
            # Prefix rows are sublane-padded to a multiple of 8 -> clean concat.
            k_i = jnp.concatenate([kp[i], k_i], axis=0)   # (T, D)
            v_i = jnp.concatenate([vp[i], v_i], axis=0)
        kT_i = k_i.T                                   # (D, T): ONE transpose per row

        # Combined causal + prefix-padding + valid-length mask, built from iota
        # and a scalar-prefetched per-batch length (no mask DMA).
        vlen = vlen_ref[b0 + i]                        # valid self-token count (SMEM)
        q_pos = lax.broadcasted_iota(jnp.int32, (S, T), 0)
        k_pos = lax.broadcasted_iota(jnp.int32, (S, T), 1)
        if has_prefix:
            self_j = k_pos - P_pad
            allowed = (k_pos < prefix_len) | (
                (k_pos >= P_pad) & (self_j <= q_pos) & (self_j < vlen))
        else:
            allowed = (k_pos <= q_pos) & (k_pos < vlen)

        # Per-head scores via lane slices of q and sublane slices of k^T
        # (no (H,S,Dh) stacks, no per-head transposes); stack along sublanes.
        s_rows = []
        for h in range(H):
            s_h = jnp.dot(q_i[:, h * Dh:(h + 1) * Dh],
                          kT_i[h * Dh:(h + 1) * Dh, :],
                          preferred_element_type=jnp.float32)      # (S, T) f32
            s_rows.append(jnp.where(allowed, s_h, -1e9))
        s_all = jnp.concatenate(s_rows, axis=0)                    # (H*S, T) f32

        # Numerically-stable softmax; reciprocal goes to the (idle) EUP slot.
        m = jnp.max(s_all, axis=-1, keepdims=True)
        p = jnp.exp(s_all - m)
        l = jnp.sum(p, axis=-1, keepdims=True)
        p = (p * pl.reciprocal(l, approx=True)).astype(jnp.bfloat16)

        # Per-head PV; the head merge is absorbed into the out-projection:
        #   attn @ w_o == sum_h (p_h @ v_h) @ w_o[h*Dh:(h+1)*Dh, :]
        # so no lane concat of (S, Dh) pieces is ever materialized.
        h_i = x[i].astype(jnp.float32)                 # residual (S, D)
        for h in range(H):
            o_h = jnp.dot(p[h * S:(h + 1) * S, :],
                          v_i[:, h * Dh:(h + 1) * Dh],
                          preferred_element_type=jnp.float32)      # (S, Dh) f32
            h_i = h_i + jnp.dot(o_h.astype(jnp.bfloat16),
                                wo_ref[h * Dh:(h + 1) * Dh, :],
                                preferred_element_type=jnp.float32)
        hidden_rows.append(h_i)

    hidden = jnp.concatenate(hidden_rows, axis=0)      # (bb*S, D) f32, sublane concat
    # Padded LM head -> lane-dense (bb*S, 128) logits store (no masked vst).
    logits = jnp.dot(hidden.astype(jnp.bfloat16), wlm_ref[...],
                     preferred_element_type=jnp.float32)
    out_ref[...] = logits.reshape(bb, S, VPAD)


def _fused_forward(params, x, vlens, kp, vp, prefix_len, has_prefix, batch_block=None):
    """x: [B,S,D] bf16; vlens: [B] int32; kp/vp: [B,P_pad,H*Dh] bf16 or None."""
    B, S, D = x.shape
    VPAD = params["w_lm"].shape[1]
    # Fold the whole batch into one block by default: at tiny S each grid step
    # pays ~0.35 us of pipeline overhead and folding doubles the matmul M dim.
    # TODO(synk): on v7x pass batch_block=B//2 so both TensorCores get work.
    bb = B if batch_block is None else batch_block
    assert B % bb == 0
    grid = (B // bb,)

    in_specs = [pl.BlockSpec((bb, S, D), lambda b, vl: (b, 0, 0))]      # x
    args = [x]
    if has_prefix:
        P_pad = kp.shape[1]
        in_specs += [
            pl.BlockSpec((bb, P_pad, D), lambda b, vl: (b, 0, 0)),      # k prefix
            pl.BlockSpec((bb, P_pad, D), lambda b, vl: (b, 0, 0)),      # v prefix
        ]
        args += [kp, vp]
    in_specs += [
        pl.BlockSpec((D, 3 * D), lambda b, vl: (0, 0)),                 # w_qkv
        pl.BlockSpec((D, D), lambda b, vl: (0, 0)),                     # w_o
        pl.BlockSpec((D, VPAD), lambda b, vl: (0, 0)),                  # w_lm (padded)
    ]
    args += [params["w_qkv"], params["w_o"], params["w_lm"]]

    kernel = functools.partial(_fused_lm_kernel, has_prefix, prefix_len)

    return pl.pallas_call(
        kernel,
        out_shape=jax.ShapeDtypeStruct((B, S, VPAD), jnp.float32),
        grid_spec=pltpu.PrefetchScalarGridSpec(
            num_scalar_prefetch=1,             # per-batch valid lengths in SMEM
            grid=grid,
            in_specs=in_specs,
            out_specs=pl.BlockSpec((bb, S, VPAD), lambda b, vl: (b, 0, 0)),
        ),
        compiler_params=pltpu.CompilerParams(
            dimension_semantics=("parallel",),     # shards batch blocks on v7x
            vmem_limit_bytes=32 * 1024 * 1024,
        ),
    )(vlens, *args)


# ----------------------------- synthetic base LM ----------------------------
def init_base_lm_params(key):
    ks = jax.random.split(key, 4)
    s = 0.02
    w_lm = s * jax.random.normal(ks[3], (HIDDEN, VOCAB), jnp.float32)
    w_lm = jnp.pad(w_lm, ((0, 0), (0, VOCAB_PAD - VOCAB)))     # lane-dense LM head
    return {
        "embed": (s * jax.random.normal(ks[0], (VOCAB, HIDDEN))).astype(jnp.bfloat16),
        "w_qkv": (s * jax.random.normal(ks[1], (HIDDEN, 3 * HIDDEN))).astype(jnp.bfloat16),
        "w_o":   (s * jax.random.normal(ks[2], (HIDDEN, HIDDEN))).astype(jnp.bfloat16),
        "w_lm":  w_lm.astype(jnp.bfloat16),
    }


def base_lm_forward(params, input_ids, attention_mask=None, past_key_values=None,
                    batch_block=None):
    """Single-layer synthetic causal LM with optional prefix KV cache (fused kernel)."""
    B, S = input_ids.shape
    # Embedding gather stays in XLA (data-dependent gather; tiny table).
    x = jnp.take(params["embed"], input_ids, axis=0)           # (B, S, D) bf16

    if past_key_values is not None:
        k_prefix, v_prefix = past_key_values[0]                # legacy (B, H, P, Dh)
        P = k_prefix.shape[2]
        P_pad = ((P + 7) // 8) * 8                             # sublane-pad the prefix

        def relayout(t):                                       # -> lane-dense [B,P_pad,H*Dh]
            t = t.transpose(0, 2, 1, 3).reshape(B, P, HIDDEN)
            return jnp.pad(t, ((0, 0), (0, P_pad - P), (0, 0))).astype(jnp.bfloat16)

        kp, vp = relayout(k_prefix), relayout(v_prefix)
        has_prefix = True
    else:
        P = 0
        kp = vp = None
        has_prefix = False

    # Attention mask -> per-batch valid self-token length (right-padding assumed;
    # exact for the all-ones masks the wrapper produces here).
    # TODO(synk): arbitrary non-contiguous attention masks would need a mask DMA.
    if attention_mask is None:
        self_mask = jnp.ones((B, S), jnp.float32)
    else:
        self_mask = attention_mask[:, -S:].astype(jnp.float32)  # drop prepended prefix ones
    vlens = jnp.sum(self_mask, axis=1).astype(jnp.int32)        # (B,)

    logits_padded = _fused_forward(params, x, vlens, kp, vp, P, has_prefix, batch_block)
    return logits_padded[:, :, :VOCAB]                          # (B, S, VOCAB)


# ------------------------------- PEFT wrapper --------------------------------
def _get_batch_size(input_ids, inputs_embeds):
    if input_ids is None and inputs_embeds is None:
        raise ValueError("You have to provide either input_ids or inputs_embeds")
    if input_ids is not None:
        return input_ids.shape[0]
    return inputs_embeds.shape[0]


class BaseModelPeftWrapper:
    """JAX/Pallas port of the PyTorch BaseModelPeftWrapper forward pass."""

    def __init__(self, base_lm_params, num_virtual_tokens):
        self.params = base_lm_params
        self.num_virtual_tokens = num_virtual_tokens
        # TODO(synk): generate() / prepare_inputs_for_generation_peft / DynamicCache
        # are HF generation-loop plumbing with no Pallas equivalent; only forward().

    def forward(self, input_ids=None, attention_mask=None, inputs_embeds=None,
                labels=None, prompts=None, **kwargs):
        if prompts is None:
            return base_lm_forward(self.params, input_ids,
                                   attention_mask=attention_mask,
                                   past_key_values=None)

        batch_size = _get_batch_size(input_ids, inputs_embeds)
        if attention_mask is not None:
            prefix_attention_mask = jnp.ones(
                (batch_size, self.num_virtual_tokens), attention_mask.dtype)
            attention_mask = jnp.concatenate(
                (prefix_attention_mask, attention_mask), axis=1)

        # position_ids / token_type_ids are ignored (matches the warnings path).
        kwargs.pop("position_ids", None)
        kwargs.pop("token_type_ids", None)
        past_key_values = prompts
        return base_lm_forward(self.params, input_ids,
                               attention_mask=attention_mask,
                               past_key_values=past_key_values)


# ------------------------------ pure-JAX reference ----------------------------
def reference_forward(params, input_ids, attention_mask, prompts):
    B, S = input_ids.shape
    embed = params["embed"].astype(jnp.float32)
    wqkv = params["w_qkv"].astype(jnp.float32)
    wo = params["w_o"].astype(jnp.float32)
    wlm = params["w_lm"].astype(jnp.float32)

    x = jnp.take(embed, input_ids, axis=0)
    qkv = jnp.einsum("bsd,df->bsf", x, wqkv)
    q, k, v = jnp.split(qkv, 3, axis=-1)

    def to_bhsd(t):
        return t.reshape(B, S, NUM_HEADS, HEAD_DIM).transpose(0, 2, 1, 3)

    q, k, v = to_bhsd(q), to_bhsd(k), to_bhsd(v)
    if prompts is not None:
        kp, vp = prompts[0]
        P = kp.shape[2]
        k = jnp.concatenate([kp.astype(jnp.float32), k], axis=2)
        v = jnp.concatenate([vp.astype(jnp.float32), v], axis=2)
        mask = jnp.concatenate(
            [jnp.ones((B, P), attention_mask.dtype), attention_mask], axis=1)
    else:
        P = 0
        mask = attention_mask
    T = P + S

    s = jnp.einsum("bhqd,bhkd->bhqk", q, k) / (HEAD_DIM ** 0.5)
    q_pos = P + jnp.arange(S)[:, None]
    k_pos = jnp.arange(T)[None, :]
    allowed = (k_pos <= q_pos)[None, None] & (mask[:, None, None, :] > 0.5)
    s = jnp.where(allowed, s, -1e9)
    p = jax.nn.softmax(s, axis=-1)
    o = jnp.einsum("bhqk,bhkd->bhqd", p, v)
    attn = o.transpose(0, 2, 1, 3).reshape(B, S, HIDDEN)
    h = x + jnp.einsum("bsd,df->bsf", attn, wo)
    return jnp.einsum("bsd,dv->bsv", h, wlm)[:, :, :VOCAB]


# ----------------------------------- main ------------------------------------
if __name__ == "__main__":
    key = jax.random.PRNGKey(0)
    k_params, k_ids, k_kp, k_vp = jax.random.split(key, 4)

    params = init_base_lm_params(k_params)
    wrapper = BaseModelPeftWrapper(params, NUM_VIRTUAL_TOKENS)

    input_ids = jax.random.randint(k_ids, (BATCH, SEQ), 0, VOCAB, jnp.int32)
    attention_mask = jnp.ones((BATCH, SEQ), jnp.float32)

    # prompts == legacy-format past_key_values: tuple of (k, v) per layer,
    # each [B, H, num_virtual_tokens, Dh]
    k_prefix = 0.02 * jax.random.normal(
        k_kp, (BATCH, NUM_HEADS, NUM_VIRTUAL_TOKENS, HEAD_DIM), jnp.float32)
    v_prefix = 0.02 * jax.random.normal(
        k_vp, (BATCH, NUM_HEADS, NUM_VIRTUAL_TOKENS, HEAD_DIM), jnp.float32)
    prompts = ((k_prefix, v_prefix),)

    # branch 1: with prompts (prefix mask prepended, prompts as past_key_values)
    logits_peft = wrapper.forward(input_ids=input_ids,
                                  attention_mask=attention_mask,
                                  prompts=prompts)
    # branch 2: prompts is None -> plain base LM forward
    logits_base = wrapper.forward(input_ids=input_ids,
                                  attention_mask=attention_mask,
                                  prompts=None)
    jax.block_until_ready((logits_peft, logits_base))

    assert logits_peft.shape == (BATCH, SEQ, VOCAB)
    assert logits_base.shape == (BATCH, SEQ, VOCAB)
    assert bool(jnp.all(jnp.isfinite(logits_peft)))
    assert bool(jnp.all(jnp.isfinite(logits_base)))

    ref_peft = reference_forward(params, input_ids, attention_mask, prompts)
    ref_base = reference_forward(params, input_ids, attention_mask, None)
    err_peft = float(jnp.max(jnp.abs(logits_peft - ref_peft)))
    err_base = float(jnp.max(jnp.abs(logits_base - ref_base)))
    assert err_peft < 3e-3, f"peft branch mismatch: {err_peft}"
    assert err_base < 3e-3, f"base branch mismatch: {err_base}"

    print("KERNEL_OK")
</pallas_src>

<mosaic_0001>
module attributes {stable_mosaic.version = 11 : i64} {
  func.func @_fused_lm_kernel(%arg0: i32, %arg1: memref<2xi32, #tpu.memory_space<smem>>, %arg2: memref<2x8x128xbf16, #tpu.memory_space<vmem>>, %arg3: memref<2x8x128xbf16, #tpu.memory_space<vmem>>, %arg4: memref<2x8x128xbf16, #tpu.memory_space<vmem>>, %arg5: memref<128x384xbf16, #tpu.memory_space<vmem>>, %arg6: memref<128x128xbf16, #tpu.memory_space<vmem>>, %arg7: memref<128x128xbf16, #tpu.memory_space<vmem>>, %arg8: memref<2x8x128xf32, #tpu.memory_space<vmem>>) attributes {dimension_semantics = [#tpu.dimension_semantics<parallel>], iteration_bounds = array<i64: 1>, scalar_prefetch = 1 : i64, scratch_operands = 0 : i64, tpu.core_type = #tpu.core_type<tc>, window_params = [{transform_indices = @transform_0, window_bounds = array<i64: 2, 8, 128>}, {transform_indices = @transform_1, window_bounds = array<i64: 2, 8, 128>}, {transform_indices = @transform_2, window_bounds = array<i64: 2, 8, 128>}, {pipeline_mode = #tpu.pipeline_mode<synchronous>, transform_indices = @transform_3, window_bounds = array<i64: 128, 384>}, {pipeline_mode = #tpu.pipeline_mode<synchronous>, transform_indices = @transform_4, window_bounds = array<i64: 128, 128>}, {pipeline_mode = #tpu.pipeline_mode<synchronous>, transform_indices = @transform_5, window_bounds = array<i64: 128, 128>}, {transform_indices = @transform_6, window_bounds = array<i64: 2, 8, 128>}]} {
    %c2_i32 = arith.constant 2 : i32
    %0 = arith.muli %arg0, %c2_i32 : i32
    %c0 = arith.constant 0 : index
    %c0_0 = arith.constant 0 : index
    %c0_1 = arith.constant 0 : index
    %1 = vector.load %arg2[%c0, %c0_0, %c0_1] : memref<2x8x128xbf16, #tpu.memory_space<vmem>>, vector<2x8x128xbf16>
    %2 = vector.shape_cast %1 : vector<2x8x128xbf16> to vector<16x128xbf16>
    %c0_2 = arith.constant 0 : index
    %c0_3 = arith.constant 0 : index
    %3 = vector.load %arg5[%c0_2, %c0_3] : memref<128x384xbf16, #tpu.memory_space<vmem>>, vector<128x384xbf16>
    %cst = arith.constant dense<0.000000e+00> : vector<16x384xf32>
    %4 = tpu.matmul %2, %3, %cst {dimension_numbers = #tpu.dot_dimension_numbers<[1], [0], [0], [1], [0, 0, 1, 1], [], []>} : vector<16x128xbf16>, vector<128x384xbf16>, vector<16x384xf32> -> vector<16x384xf32>
    %5 = vector.extract_strided_slice %4 {offsets = [0, 0], sizes = [16, 128], strides = [1, 1]} : vector<16x384xf32> to vector<16x128xf32>
    %cst_4 = arith.constant 0.176776692 : f32
    %6 = vector.broadcast %cst_4 : f32 to vector<16x128xf32>
    %7 = arith.mulf %5, %6 : vector<16x128xf32>
    %8 = arith.truncf %7 : vector<16x128xf32> to vector<16x128xbf16>
    %9 = vector.extract_strided_slice %4 {offsets = [0, 128], sizes = [16, 128], strides = [1, 1]} : vector<16x384xf32> to vector<16x128xf32>
    %10 = arith.truncf %9 : vector<16x128xf32> to vector<16x128xbf16>
    %11 = vector.extract_strided_slice %4 {offsets = [0, 256], sizes = [16, 128], strides = [1, 1]} : vector<16x384xf32> to vector<16x128xf32>
    %12 = arith.truncf %11 : vector<16x128xf32> to vector<16x128xbf16>
    %c0_5 = arith.constant 0 : index
    %c0_6 = arith.constant 0 : index
    %c0_7 = arith.constant 0 : index
    %13 = vector.load %arg3[%c0_5, %c0_6, %c0_7] : memref<2x8x128xbf16, #tpu.memory_space<vmem>>, vector<2x8x128xbf16>
    %c0_8 = arith.constant 0 : index
    %c0_9 = arith.constant 0 : index
    %c0_10 = arith.constant 0 : index
    %14 = vector.load %arg4[%c0_8, %c0_9, %c0_10] : memref<2x8x128xbf16, #tpu.memory_space<vmem>>, vector<2x8x128xbf16>
    %15 = vector.extract_strided_slice %8 {offsets = [0, 0], sizes = [8, 128], strides = [1, 1]} : vector<16x128xbf16> to vector<8x128xbf16>
    %16 = vector.extract_strided_slice %10 {offsets = [0, 0], sizes = [8, 128], strides = [1, 1]} : vector<16x128xbf16> to vector<8x128xbf16>
    %17 = vector.extract_strided_slice %12 {offsets = [0, 0], sizes = [8, 128], strides = [1, 1]} : vector<16x128xbf16> to vector<8x128xbf16>
    %18 = vector.extract_strided_slice %13 {offsets = [0, 0, 0], sizes = [1, 8, 128], strides = [1, 1, 1]} : vector<2x8x128xbf16> to vector<1x8x128xbf16>
    %19 = vector.shape_cast %18 : vector<1x8x128xbf16> to vector<8x128xbf16>
    %20 = tpu.concatenate %19, %16 in 0 : vector<8x128xbf16>, vector<8x128xbf16> -> vector<16x128xbf16>
    %21 = vector.extract_strided_slice %14 {offsets = [0, 0, 0], sizes = [1, 8, 128], strides = [1, 1, 1]} : vector<2x8x128xbf16> to vector<1x8x128xbf16>
    %22 = vector.shape_cast %21 : vector<1x8x128xbf16> to vector<8x128xbf16>
    %23 = tpu.concatenate %22, %17 in 0 : vector<8x128xbf16>, vector<8x128xbf16> -> vector<16x128xbf16>
    %24 = tpu.transpose %20, [1, 0] : vector<16x128xbf16> -> vector<128x16xbf16>
    %c0_i32 = arith.constant 0 : i32
    %25 = arith.addi %0, %c0_i32 : i32
    %26 = arith.index_cast %25 : i32 to index
    %27 = memref.load %arg1[%26] : memref<2xi32, #tpu.memory_space<smem>>
    %28 = tpu.iota {dimensions = array<i32: 0>} : vector<8x16xi32>
    %29 = tpu.iota {dimensions = array<i32: 1>} : vector<8x16xi32>
    %c8_i32 = arith.constant 8 : i32
    %30 = vector.broadcast %c8_i32 : i32 to vector<8x16xi32>
    %31 = arith.subi %29, %30 : vector<8x16xi32>
    %c4_i32 = arith.constant 4 : i32
    %32 = vector.broadcast %c4_i32 : i32 to vector<8x16xi32>
    %33 = arith.cmpi slt, %29, %32 : vector<8x16xi32>
    %c8_i32_11 = arith.constant 8 : i32
    %34 = vector.broadcast %c8_i32_11 : i32 to vector<8x16xi32>
    %35 = arith.cmpi sge, %29, %34 : vector<8x16xi32>
    %36 = arith.cmpi sle, %31, %28 : vector<8x16xi32>
    %37 = arith.andi %35, %36 : vector<8x16xi1>
    %38 = vector.broadcast %27 : i32 to vector<8x16xi32>
    %39 = arith.cmpi slt, %31, %38 : vector<8x16xi32>
    %40 = arith.andi %37, %39 : vector<8x16xi1>
    %41 = arith.ori %33, %40 : vector<8x16xi1>
    %42 = vector.extract_strided_slice %15 {offsets = [0, 0], sizes = [8, 32], strides = [1, 1]} : vector<8x128xbf16> to vector<8x32xbf16>
    %43 = vector.extract_strided_slice %24 {offsets = [0, 0], sizes = [32, 16], strides = [1, 1]} : vector<128x16xbf16> to vector<32x16xbf16>
    %cst_12 = arith.constant dense<0.000000e+00> : vector<8x16xf32>
    %44 = tpu.matmul %42, %43, %cst_12 {dimension_numbers = #tpu.dot_dimension_numbers<[1], [0], [0], [1], [0, 0, 1, 1], [], []>} : vector<8x32xbf16>, vector<32x16xbf16>, vector<8x16xf32> -> vector<8x16xf32>
    %cst_13 = arith.constant -1.000000e+09 : f32
    %45 = vector.broadcast %cst_13 : f32 to vector<8x16xf32>
    %46 = arith.select %41, %44, %45 : vector<8x16xi1>, vector<8x16xf32>
    %47 = vector.extract_strided_slice %15 {offsets = [0, 32], sizes = [8, 32], strides = [1, 1]} : vector<8x128xbf16> to vector<8x32xbf16>
    %48 = vector.extract_strided_slice %24 {offsets = [32, 0], sizes = [32, 16], strides = [1, 1]} : vector<128x16xbf16> to vector<32x16xbf16>
    %cst_14 = arith.constant dense<0.000000e+00> : vector<8x16xf32>
    %49 = tpu.matmul %47, %48, %cst_14 {dimension_numbers = #tpu.dot_dimension_numbers<[1], [0], [0], [1], [0, 0, 1, 1], [], []>} : vector<8x32xbf16>, vector<32x16xbf16>, vector<8x16xf32> -> vector<8x16xf32>
    %cst_15 = arith.constant -1.000000e+09 : f32
    %50 = vector.broadcast %cst_15 : f32 to vector<8x16xf32>
    %51 = arith.select %41, %49, %50 : vector<8x16xi1>, vector<8x16xf32>
    %52 = vector.extract_strided_slice %15 {offsets = [0, 64], sizes = [8, 32], strides = [1, 1]} : vector<8x128xbf16> to vector<8x32xbf16>
    %53 = vector.extract_strided_slice %24 {offsets = [64, 0], sizes = [32, 16], strides = [1, 1]} : vector<128x16xbf16> to vector<32x16xbf16>
    %cst_16 = arith.constant dense<0.000000e+00> : vector<8x16xf32>
    %54 = tpu.matmul %52, %53, %cst_16 {dimension_numbers = #tpu.dot_dimension_numbers<[1], [0], [0], [1], [0, 0, 1, 1], [], []>} : vector<8x32xbf16>, vector<32x16xbf16>, vector<8x16xf32> -> vector<8x16xf32>
    %cst_17 = arith.constant -1.000000e+09 : f32
    %55 = vector.broadcast %cst_17 : f32 to vector<8x16xf32>
    %56 = arith.select %41, %54, %55 : vector<8x16xi1>, vector<8x16xf32>
    %57 = vector.extract_strided_slice %15 {offsets = [0, 96], sizes = [8, 32], strides = [1, 1]} : vector<8x128xbf16> to vector<8x32xbf16>
    %58 = vector.extract_strided_slice %24 {offsets = [96, 0], sizes = [32, 16], strides = [1, 1]} : vector<128x16xbf16> to vector<32x16xbf16>
    %cst_18 = arith.constant dense<0.000000e+00> : vector<8x16xf32>
    %59 = tpu.matmul %57, %58, %cst_18 {dimension_numbers = #tpu.dot_dimension_numbers<[1], [0], [0], [1], [0, 0, 1, 1], [], []>} : vector<8x32xbf16>, vector<32x16xbf16>, vector<8x16xf32> -> vector<8x16xf32>
    %cst_19 = arith.constant -1.000000e+09 : f32
    %60 = vector.broadcast %cst_19 : f32 to vector<8x16xf32>
    %61 = arith.select %41, %59, %60 : vector<8x16xi1>, vector<8x16xf32>
    %62 = tpu.concatenate %46, %51, %56, %61 in 0 : vector<8x16xf32>, vector<8x16xf32>, vector<8x16xf32>, vector<8x16xf32> -> vector<32x16xf32>
    %cst_20 = arith.constant dense<0xFF800000> : vector<32xf32>
    %63 = vector.multi_reduction <maximumf>, %62, %cst_20 [1] : vector<32x16xf32> to vector<32xf32>
    %64 = vector.shape_cast %63 : vector<32xf32> to vector<32x1xf32>
    %65 = vector.broadcast %64 : vector<32x1xf32> to vector<32x16xf32>
    %66 = arith.subf %62, %65 : vector<32x16xf32>
    %67 = math.exp %66 : vector<32x16xf32>
    %cst_21 = arith.constant dense<0.000000e+00> : vector<32xf32>
    %68 = vector.multi_reduction <add>, %67, %cst_21 [1] : vector<32x16xf32> to vector<32xf32>
    %69 = vector.shape_cast %68 : vector<32xf32> to vector<32x1xf32>
    %70 = tpu.reciprocal %69 {approx = true} : vector<32x1xf32> -> vector<32x1xf32>
    %71 = vector.broadcast %70 : vector<32x1xf32> to vector<32x16xf32>
    %72 = arith.mulf %67, %71 : vector<32x16xf32>
    %73 = arith.truncf %72 : vector<32x16xf32> to vector<32x16xbf16>
    %74 = vector.extract_strided_slice %1 {offsets = [0, 0, 0], sizes = [1, 8, 128], strides = [1, 1, 1]} : vector<2x8x128xbf16> to vector<1x8x128xbf16>
    %75 = vector.shape_cast %74 : vector<1x8x128xbf16> to vector<8x128xbf16>
    %76 = arith.extf %75 : vector<8x128xbf16> to vector<8x128xf32>
    %77 = vector.extract_strided_slice %73 {offsets = [0, 0], sizes = [8, 16], strides = [1, 1]} : vector<32x16xbf16> to vector<8x16xbf16>
    %78 = vector.extract_strided_slice %23 {offsets = [0, 0], sizes = [16, 32], strides = [1, 1]} : vector<16x128xbf16> to vector<16x32xbf16>
    %cst_22 = arith.constant dense<0.000000e+00> : vector<8x32xf32>
    %79 = tpu.matmul %77, %78, %cst_22 {dimension_numbers = #tpu.dot_dimension_numbers<[1], [0], [0], [1], [0, 0, 1, 1], [], []>} : vector<8x16xbf16>, vector<16x32xbf16>, vector<8x32xf32> -> vector<8x32xf32>
    %80 = arith.truncf %79 : vector<8x32xf32> to vector<8x32xbf16>
    %c0_23 = arith.constant 0 : index
    %c0_24 = arith.constant 0 : index
    %81 = vector.load %arg6[%c0_23, %c0_24] : memref<128x128xbf16, #tpu.memory_space<vmem>>, vector<32x128xbf16>
    %cst_25 = arith.constant dense<0.000000e+00> : vector<8x128xf32>
    %82 = tpu.matmul %80, %81, %cst_25 {dimension_numbers = #tpu.dot_dimension_numbers<[1], [0], [0], [1], [0, 0, 1, 1], [], []>} : vector<8x32xbf16>, vector<32x128xbf16>, vector<8x128xf32> -> vector<8x128xf32>
    %83 = arith.addf %76, %82 : vector<8x128xf32>
    %84 = vector.extract_strided_slice %73 {offsets = [8, 0], sizes = [8, 16], strides = [1, 1]} : vector<32x16xbf16> to vector<8x16xbf16>
    %85 = vector.extract_strided_slice %23 {offsets = [0, 32], sizes = [16, 32], strides = [1, 1]} : vector<16x128xbf16> to vector<16x32xbf16>
    %cst_26 = arith.constant dense<0.000000e+00> : vector<8x32xf32>
    %86 = tpu.matmul %84, %85, %cst_26 {dimension_numbers = #tpu.dot_dimension_numbers<[1], [0], [0], [1], [0, 0, 1, 1], [], []>} : vector<8x16xbf16>, vector<16x32xbf16>, vector<8x32xf32> -> vector<8x32xf32>
    %87 = arith.truncf %86 : vector<8x32xf32> to vector<8x32xbf16>
    %c32 = arith.constant 32 : index
    %c0_27 = arith.constant 0 : index
    %88 = vector.load %arg6[%c32, %c0_27] : memref<128x128xbf16, #tpu.memory_space<vmem>>, vector<32x128xbf16>
    %cst_28 = arith.constant dense<0.000000e+00> : vector<8x128xf32>
    %89 = tpu.matmul %87, %88, %cst_28 {dimension_numbers = #tpu.dot_dimension_numbers<[1], [0], [0], [1], [0, 0, 1, 1], [], []>} : vector<8x32xbf16>, vector<32x128xbf16>, vector<8x128xf32> -> vector<8x128xf32>
    %90 = arith.addf %83, %89 : vector<8x128xf32>
    %91 = vector.extract_strided_slice %73 {offsets = [16, 0], sizes = [8, 16], strides = [1, 1]} : vector<32x16xbf16> to vector<8x16xbf16>
    %92 = vector.extract_strided_slice %23 {offsets = [0, 64], sizes = [16, 32], strides = [1, 1]} : vector<16x128xbf16> to vector<16x32xbf16>
    %cst_29 = arith.constant dense<0.000000e+00> : vector<8x32xf32>
    %93 = tpu.matmul %91, %92, %cst_29 {dimension_numbers = #tpu.dot_dimension_numbers<[1], [0], [0], [1], [0, 0, 1, 1], [], []>} : vector<8x16xbf16>, vector<16x32xbf16>, vector<8x32xf32> -> vector<8x32xf32>
    %94 = arith.truncf %93 : vector<8x32xf32> to vector<8x32xbf16>
    %c64 = arith.constant 64 : index
    %c0_30 = arith.constant 0 : index
    %95 = vector.load %arg6[%c64, %c0_30] : memref<128x128xbf16, #tpu.memory_space<vmem>>, vector<32x128xbf16>
    %cst_31 = arith.constant dense<0.000000e+00> : vector<8x128xf32>
    %96 = tpu.matmul %94, %95, %cst_31 {dimension_numbers = #tpu.dot_dimension_numbers<[1], [0], [0], [1], [0, 0, 1, 1], [], []>} : vector<8x32xbf16>, vector<32x128xbf16>, vector<8x128xf32> -> vector<8x128xf32>
    %97 = arith.addf %90, %96 : vector<8x128xf32>
    %98 = vector.extract_strided_slice %73 {offsets = [24, 0], sizes = [8, 16], strides = [1, 1]} : vector<32x16xbf16> to vector<8x16xbf16>
    %99 = vector.extract_strided_slice %23 {offsets = [0, 96], sizes = [16, 32], strides = [1, 1]} : vector<16x128xbf16> to vector<16x32xbf16>
    %cst_32 = arith.constant dense<0.000000e+00> : vector<8x32xf32>
    %100 = tpu.matmul %98, %99, %cst_32 {dimension_numbers = #tpu.dot_dimension_numbers<[1], [0], [0], [1], [0, 0, 1, 1], [], []>} : vector<8x16xbf16>, vector<16x32xbf16>, vector<8x32xf32> -> vector<8x32xf32>
    %101 = arith.truncf %100 : vector<8x32xf32> to vector<8x32xbf16>
    %c96 = arith.constant 96 : index
    %c0_33 = arith.constant 0 : index
    %102 = vector.load %arg6[%c96, %c0_33] : memref<128x128xbf16, #tpu.memory_space<vmem>>, vector<32x128xbf16>
    %cst_34 = arith.constant dense<0.000000e+00> : vector<8x128xf32>
    %103 = tpu.matmul %101, %102, %cst_34 {dimension_numbers = #tpu.dot_dimension_numbers<[1], [0], [0], [1], [0, 0, 1, 1], [], []>} : vector<8x32xbf16>, vector<32x128xbf16>, vector<8x128xf32> -> vector<8x128xf32>
    %104 = arith.addf %97, %103 : vector<8x128xf32>
    %105 = vector.extract_strided_slice %8 {offsets = [8, 0], sizes = [8, 128], strides = [1, 1]} : vector<16x128xbf16> to vector<8x128xbf16>
    %106 = vector.extract_strided_slice %10 {offsets = [8, 0], sizes = [8, 128], strides = [1, 1]} : vector<16x128xbf16> to vector<8x128xbf16>
    %107 = vector.extract_strided_slice %12 {offsets = [8, 0], sizes = [8, 128], strides = [1, 1]} : vector<16x128xbf16> to vector<8x128xbf16>
    %108 = vector.extract_strided_slice %13 {offsets = [1, 0, 0], sizes = [1, 8, 128], strides = [1, 1, 1]} : vector<2x8x128xbf16> to vector<1x8x128xbf16>
    %109 = vector.shape_cast %108 : vector<1x8x128xbf16> to vector<8x128xbf16>
    %110 = tpu.concatenate %109, %106 in 0 : vector<8x128xbf16>, vector<8x128xbf16> -> vector<16x128xbf16>
    %111 = vector.extract_strided_slice %14 {offsets = [1, 0, 0], sizes = [1, 8, 128], strides = [1, 1, 1]} : vector<2x8x128xbf16> to vector<1x8x128xbf16>
    %112 = vector.shape_cast %111 : vector<1x8x128xbf16> to vector<8x128xbf16>
    %113 = tpu.concatenate %112, %107 in 0 : vector<8x128xbf16>, vector<8x128xbf16> -> vector<16x128xbf16>
    %114 = tpu.transpose %110, [1, 0] : vector<16x128xbf16> -> vector<128x16xbf16>
    %c1_i32 = arith.constant 1 : i32
    %115 = arith.addi %0, %c1_i32 : i32
    %116 = arith.index_cast %115 : i32 to index
    %117 = memref.load %arg1[%116] : memref<2xi32, #tpu.memory_space<smem>>
    %118 = tpu.iota {dimensions = array<i32: 0>} : vector<8x16xi32>
    %119 = tpu.iota {dimensions = array<i32: 1>} : vector<8x16xi32>
    %c8_i32_35 = arith.constant 8 : i32
    %120 = vector.broadcast %c8_i32_35 : i32 to vector<8x16xi32>
    %121 = arith.subi %119, %120 : vector<8x16xi32>
    %c4_i32_36 = arith.constant 4 : i32
    %122 = vector.broadcast %c4_i32_36 : i32 to vector<8x16xi32>
    %123 = arith.cmpi slt, %119, %122 : vector<8x16xi32>
    %c8_i32_37 = arith.constant 8 : i32
    %124 = vector.broadcast %c8_i32_37 : i32 to vector<8x16xi32>
    %125 = arith.cmpi sge, %119, %124 : vector<8x16xi32>
    %126 = arith.cmpi sle, %121, %118 : vector<8x16xi32>
    %127 = arith.andi %125, %126 : vector<8x16xi1>
    %128 = vector.broadcast %117 : i32 to vector<8x16xi32>
    %129 = arith.cmpi slt, %121, %128 : vector<8x16xi32>
    %130 = arith.andi %127, %129 : vector<8x16xi1>
    %131 = arith.ori %123, %130 : vector<8x16xi1>
    %132 = vector.extract_strided_slice %105 {offsets = [0, 0], sizes = [8, 32], strides = [1, 1]} : vector<8x128xbf16> to vector<8x32xbf16>
    %133 = vector.extract_strided_slice %114 {offsets = [0, 0], sizes = [32, 16], strides = [1, 1]} : vector<128x16xbf16> to vector<32x16xbf16>
    %cst_38 = arith.constant dense<0.000000e+00> : vector<8x16xf32>
    %134 = tpu.matmul %132, %133, %cst_38 {dimension_numbers = #tpu.dot_dimension_numbers<[1], [0], [0], [1], [0, 0, 1, 1], [], []>} : vector<8x32xbf16>, vector<32x16xbf16>, vector<8x16xf32> -> vector<8x16xf32>
    %cst_39 = arith.constant -1.000000e+09 : f32
    %135 = vector.broadcast %cst_39 : f32 to vector<8x16xf32>
    %136 = arith.select %131, %134, %135 : vector<8x16xi1>, vector<8x16xf32>
    %137 = vector.extract_strided_slice %105 {offsets = [0, 32], sizes = [8, 32], strides = [1, 1]} : vector<8x128xbf16> to vector<8x32xbf16>
    %138 = vector.extract_strided_slice %114 {offsets = [32, 0], sizes = [32, 16], strides = [1, 1]} : vector<128x16xbf16> to vector<32x16xbf16>
    %cst_40 = arith.constant dense<0.000000e+00> : vector<8x16xf32>
    %139 = tpu.matmul %137, %138, %cst_40 {dimension_numbers = #tpu.dot_dimension_numbers<[1], [0], [0], [1], [0, 0, 1, 1], [], []>} : vector<8x32xbf16>, vector<32x16xbf16>, vector<8x16xf32> -> vector<8x16xf32>
    %cst_41 = arith.constant -1.000000e+09 : f32
    %140 = vector.broadcast %cst_41 : f32 to vector<8x16xf32>
    %141 = arith.select %131, %139, %140 : vector<8x16xi1>, vector<8x16xf32>
    %142 = vector.extract_strided_slice %105 {offsets = [0, 64], sizes = [8, 32], strides = [1, 1]} : vector<8x128xbf16> to vector<8x32xbf16>
    %143 = vector.extract_strided_slice %114 {offsets = [64, 0], sizes = [32, 16], strides = [1, 1]} : vector<128x16xbf16> to vector<32x16xbf16>
    %cst_42 = arith.constant dense<0.000000e+00> : vector<8x16xf32>
    %144 = tpu.matmul %142, %143, %cst_42 {dimension_numbers = #tpu.dot_dimension_numbers<[1], [0], [0], [1], [0, 0, 1, 1], [], []>} : vector<8x32xbf16>, vector<32x16xbf16>, vector<8x16xf32> -> vector<8x16xf32>
    %cst_43 = arith.constant -1.000000e+09 : f32
    %145 = vector.broadcast %cst_43 : f32 to vector<8x16xf32>
    %146 = arith.select %131, %144, %145 : vector<8x16xi1>, vector<8x16xf32>
    %147 = vector.extract_strided_slice %105 {offsets = [0, 96], sizes = [8, 32], strides = [1, 1]} : vector<8x128xbf16> to vector<8x32xbf16>
    %148 = vector.extract_strided_slice %114 {offsets = [96, 0], sizes = [32, 16], strides = [1, 1]} : vector<128x16xbf16> to vector<32x16xbf16>
    %cst_44 = arith.constant dense<0.000000e+00> : vector<8x16xf32>
    %149 = tpu.matmul %147, %148, %cst_44 {dimension_numbers = #tpu.dot_dimension_numbers<[1], [0], [0], [1], [0, 0, 1, 1], [], []>} : vector<8x32xbf16>, vector<32x16xbf16>, vector<8x16xf32> -> vector<8x16xf32>
    %cst_45 = arith.constant -1.000000e+09 : f32
    %150 = vector.broadcast %cst_45 : f32 to vector<8x16xf32>
    %151 = arith.select %131, %149, %150 : vector<8x16xi1>, vector<8x16xf32>
    %152 = tpu.concatenate %136, %141, %146, %151 in 0 : vector<8x16xf32>, vector<8x16xf32>, vector<8x16xf32>, vector<8x16xf32> -> vector<32x16xf32>
    %cst_46 = arith.constant dense<0xFF800000> : vector<32xf32>
    %153 = vector.multi_reduction <maximumf>, %152, %cst_46 [1] : vector<32x16xf32> to vector<32xf32>
    %154 = vector.shape_cast %153 : vector<32xf32> to vector<32x1xf32>
    %155 = vector.broadcast %154 : vector<32x1xf32> to vector<32x16xf32>
    %156 = arith.subf %152, %155 : vector<32x16xf32>
    %157 = math.exp %156 : vector<32x16xf32>
    %cst_47 = arith.constant dense<0.000000e+00> : vector<32xf32>
    %158 = vector.multi_reduction <add>, %157, %cst_47 [1] : vector<32x16xf32> to vector<32xf32>
    %159 = vector.shape_cast %158 : vector<32xf32> to vector<32x1xf32>
    %160 = tpu.reciprocal %159 {approx = true} : vector<32x1xf32> -> vector<32x1xf32>
    %161 = vector.broadcast %160 : vector<32x1xf32> to vector<32x16xf32>
    %162 = arith.mulf %157, %161 : vector<32x16xf32>
    %163 = arith.truncf %162 : vector<32x16xf32> to vector<32x16xbf16>
    %164 = vector.extract_strided_slice %1 {offsets = [1, 0, 0], sizes = [1, 8, 128], strides = [1, 1, 1]} : vector<2x8x128xbf16> to vector<1x8x128xbf16>
    %165 = vector.shape_cast %164 : vector<1x8x128xbf16> to vector<8x128xbf16>
    %166 = arith.extf %165 : vector<8x128xbf16> to vector<8x128xf32>
    %167 = vector.extract_strided_slice %163 {offsets = [0, 0], sizes = [8, 16], strides = [1, 1]} : vector<32x16xbf16> to vector<8x16xbf16>
    %168 = vector.extract_strided_slice %113 {offsets = [0, 0], sizes = [16, 32], strides = [1, 1]} : vector<16x128xbf16> to vector<16x32xbf16>
    %cst_48 = arith.constant dense<0.000000e+00> : vector<8x32xf32>
    %169 = tpu.matmul %167, %168, %cst_48 {dimension_numbers = #tpu.dot_dimension_numbers<[1], [0], [0], [1], [0, 0, 1, 1], [], []>} : vector<8x16xbf16>, vector<16x32xbf16>, vector<8x32xf32> -> vector<8x32xf32>
    %170 = arith.truncf %169 : vector<8x32xf32> to vector<8x32xbf16>
    %c0_49 = arith.constant 0 : index
    %c0_50 = arith.constant 0 : index
    %171 = vector.load %arg6[%c0_49, %c0_50] : memref<128x128xbf16, #tpu.memory_space<vmem>>, vector<32x128xbf16>
    %cst_51 = arith.constant dense<0.000000e+00> : vector<8x128xf32>
    %172 = tpu.matmul %170, %171, %cst_51 {dimension_numbers = #tpu.dot_dimension_numbers<[1], [0], [0], [1], [0, 0, 1, 1], [], []>} : vector<8x32xbf16>, vector<32x128xbf16>, vector<8x128xf32> -> vector<8x128xf32>
    %173 = arith.addf %166, %172 : vector<8x128xf32>
    %174 = vector.extract_strided_slice %163 {offsets = [8, 0], sizes = [8, 16], strides = [1, 1]} : vector<32x16xbf16> to vector<8x16xbf16>
    %175 = vector.extract_strided_slice %113 {offsets = [0, 32], sizes = [16, 32], strides = [1, 1]} : vector<16x128xbf16> to vector<16x32xbf16>
    %cst_52 = arith.constant dense<0.000000e+00> : vector<8x32xf32>
    %176 = tpu.matmul %174, %175, %cst_52 {dimension_numbers = #tpu.dot_dimension_numbers<[1], [0], [0], [1], [0, 0, 1, 1], [], []>} : vector<8x16xbf16>, vector<16x32xbf16>, vector<8x32xf32> -> vector<8x32xf32>
    %177 = arith.truncf %176 : vector<8x32xf32> to vector<8x32xbf16>
    %c32_53 = arith.constant 32 : index
    %c0_54 = arith.constant 0 : index
    %178 = vector.load %arg6[%c32_53, %c0_54] : memref<128x128xbf16, #tpu.memory_space<vmem>>, vector<32x128xbf16>
    %cst_55 = arith.constant dense<0.000000e+00> : vector<8x128xf32>
    %179 = tpu.matmul %177, %178, %cst_55 {dimension_numbers = #tpu.dot_dimension_numbers<[1], [0], [0], [1], [0, 0, 1, 1], [], []>} : vector<8x32xbf16>, vector<32x128xbf16>, vector<8x128xf32> -> vector<8x128xf32>
    %180 = arith.addf %173, %179 : vector<8x128xf32>
    %181 = vector.extract_strided_slice %163 {offsets = [16, 0], sizes = [8, 16], strides = [1, 1]} : vector<32x16xbf16> to vector<8x16xbf16>
    %182 = vector.extract_strided_slice %113 {offsets = [0, 64], sizes = [16, 32], strides = [1, 1]} : vector<16x128xbf16> to vector<16x32xbf16>
    %cst_56 = arith.constant dense<0.000000e+00> : vector<8x32xf32>
    %183 = tpu.matmul %181, %182, %cst_56 {dimension_numbers = #tpu.dot_dimension_numbers<[1], [0], [0], [1], [0, 0, 1, 1], [], []>} : vector<8x16xbf16>, vector<16x32xbf16>, vector<8x32xf32> -> vector<8x32xf32>
    %184 = arith.truncf %183 : vector<8x32xf32> to vector<8x32xbf16>
    %c64_57 = arith.constant 64 : index
    %c0_58 = arith.constant 0 : index
    %185 = vector.load %arg6[%c64_57, %c0_58] : memref<128x128xbf16, #tpu.memory_space<vmem>>, vector<32x128xbf16>
    %cst_59 = arith.constant dense<0.000000e+00> : vector<8x128xf32>
    %186 = tpu.matmul %184, %185, %cst_59 {dimension_numbers = #tpu.dot_dimension_numbers<[1], [0], [0], [1], [0, 0, 1, 1], [], []>} : vector<8x32xbf16>, vector<32x128xbf16>, vector<8x128xf32> -> vector<8x128xf32>
    %187 = arith.addf %180, %186 : vector<8x128xf32>
    %188 = vector.extract_strided_slice %163 {offsets = [24, 0], sizes = [8, 16], strides = [1, 1]} : vector<32x16xbf16> to vector<8x16xbf16>
    %189 = vector.extract_strided_slice %113 {offsets = [0, 96], sizes = [16, 32], strides = [1, 1]} : vector<16x128xbf16> to vector<16x32xbf16>
    %cst_60 = arith.constant dense<0.000000e+00> : vector<8x32xf32>
    %190 = tpu.matmul %188, %189, %cst_60 {dimension_numbers = #tpu.dot_dimension_numbers<[1], [0], [0], [1], [0, 0, 1, 1], [], []>} : vector<8x16xbf16>, vector<16x32xbf16>, vector<8x32xf32> -> vector<8x32xf32>
    %191 = arith.truncf %190 : vector<8x32xf32> to vector<8x32xbf16>
    %c96_61 = arith.constant 96 : index
    %c0_62 = arith.constant 0 : index
    %192 = vector.load %arg6[%c96_61, %c0_62] : memref<128x128xbf16, #tpu.memory_space<vmem>>, vector<32x128xbf16>
    %cst_63 = arith.constant dense<0.000000e+00> : vector<8x128xf32>
    %193 = tpu.matmul %191, %192, %cst_63 {dimension_numbers = #tpu.dot_dimension_numbers<[1], [0], [0], [1], [0, 0, 1, 1], [], []>} : vector<8x32xbf16>, vector<32x128xbf16>, vector<8x128xf32> -> vector<8x128xf32>
    %194 = arith.addf %187, %193 : vector<8x128xf32>
    %195 = tpu.concatenate %104, %194 in 0 : vector<8x128xf32>, vector<8x128xf32> -> vector<16x128xf32>
    %196 = arith.truncf %195 : vector<16x128xf32> to vector<16x128xbf16>
    %c0_64 = arith.constant 0 : index
    %c0_65 = arith.constant 0 : index
    %197 = vector.load %arg7[%c0_64, %c0_65] : memref<128x128xbf16, #tpu.memory_space<vmem>>, vector<128x128xbf16>
    %cst_66 = arith.constant dense<0.000000e+00> : vector<16x128xf32>
    %198 = tpu.matmul %196, %197, %cst_66 {dimension_numbers = #tpu.dot_dimension_numbers<[1], [0], [0], [1], [0, 0, 1, 1], [], []>} : vector<16x128xbf16>, vector<128x128xbf16>, vector<16x128xf32> -> vector<16x128xf32>
    %199 = vector.shape_cast %198 : vector<16x128xf32> to vector<2x8x128xf32>
    %c0_67 = arith.constant 0 : index
    %c0_68 = arith.constant 0 : index
    %c0_69 = arith.constant 0 : index
    %200 = vector.load %arg8[%c0_67, %c0_68, %c0_69] : memref<2x8x128xf32, #tpu.memory_space<vmem>>, vector<2x8x128xf32>
    tpu.vector_store %arg8[%c0_67, %c0_68, %c0_69], %199 {strides = array<i32>} : memref<2x8x128xf32, #tpu.memory_space<vmem>>, vector<2x8x128xf32>,
    return
  }
  func.func @transform_0(%arg0: i32, %arg1: memref<2xi32, #tpu.memory_space<smem>>) -> (i32, i32, i32) {
    %c0_i32 = arith.constant 0 : i32
    %c0_i32_0 = arith.constant 0 : i32
    %c0_i32_1 = arith.constant 0 : i32
    return %arg0, %c0_i32, %c0_i32_0 : i32, i32, i32
  }
  func.func @transform_1(%arg0: i32, %arg1: memref<2xi32, #tpu.memory_space<smem>>) -> (i32, i32, i32) {
    %c0_i32 = arith.constant 0 : i32
    %c0_i32_0 = arith.constant 0 : i32
    %c0_i32_1 = arith.constant 0 : i32
    return %arg0, %c0_i32, %c0_i32_0 : i32, i32, i32
  }
  func.func @transform_2(%arg0: i32, %arg1: memref<2xi32, #tpu.memory_space<smem>>) -> (i32, i32, i32) {
    %c0_i32 = arith.constant 0 : i32
    %c0_i32_0 = arith.constant 0 : i32
    %c0_i32_1 = arith.constant 0 : i32
    return %arg0, %c0_i32, %c0_i32_0 : i32, i32, i32
  }
  func.func @transform_3(%arg0: i32, %arg1: memref<2xi32, #tpu.memory_space<smem>>) -> (i32, i32) {
    %c0_i32 = arith.constant 0 : i32
    %c0_i32_0 = arith.constant 0 : i32
    %c0_i32_1 = arith.constant 0 : i32
    return %c0_i32, %c0_i32_0 : i32, i32
  }
  func.func @transform_4(%arg0: i32, %arg1: memref<2xi32, #tpu.memory_space<smem>>) -> (i32, i32) {
    %c0_i32 = arith.constant 0 : i32
    %c0_i32_0 = arith.constant 0 : i32
    %c0_i32_1 = arith.constant 0 : i32
    return %c0_i32, %c0_i32_0 : i32, i32
  }
  func.func @transform_5(%arg0: i32, %arg1: memref<2xi32, #tpu.memory_space<smem>>) -> (i32, i32) {
    %c0_i32 = arith.constant 0 : i32
    %c0_i32_0 = arith.constant 0 : i32
    %c0_i32_1 = arith.constant 0 : i32
    return %c0_i32, %c0_i32_0 : i32, i32
  }
  func.func @transform_6(%arg0: i32, %arg1: memref<2xi32, #tpu.memory_space<smem>>) -> (i32, i32, i32) {
    %c0_i32 = arith.constant 0 : i32
    %c0_i32_0 = arith.constant 0 : i32
    %c0_i32_1 = arith.constant 0 : i32
    return %arg0, %c0_i32, %c0_i32_0 : i32, i32, i32
  }
}

</mosaic_0001>

<bundles_post_ra>
// kernel: tpu_custom_call.1
= control target key start
LH: loop header
LB: loop body
LE: loop exit
PB: predicated region body
PF: predicated region fallthrough
CT: control target
= control target key end

     0   :  { %s2437_s24 = smov [#allocation3]   ;;  %s2822_s0 = inlined_call_operand.hbm [shape: s32[2], index: 0, kind: input, shape index: {}]   ;;  %s2823_s1 = inlined_call_operand.hbm [shape: bf16[2,8,128], index: 1, kind: input, shape index: {}]   ;;  %s2824_s2 = inlined_call_operand.hbm [shape: bf16[2,8,128], index: 2, kind: input, shape index: {}]   ;;  %s2825_s3 = inlined_call_operand.hbm [shape: bf16[2,8,128], index: 3, kind: input, shape index: {}]   ;;  %s2826_s4 = inlined_call_operand.hbm [shape: bf16[128,384], index: 4, kind: input, shape index: {}]   ;;  %s2827_s5 = inlined_call_operand.hbm [shape: bf16[128,128], index: 5, kind: input, shape index: {}]   ;;  %s2828_s6 = inlined_call_operand.hbm [shape: bf16[128,128], index: 6, kind: input, shape index: {}]   ;;  %s2829_s7 = inlined_call_operand.hbm [shape: f32[2,8,128], index: 7, kind: output, shape index: {}]  }
   0x1   :  { %13 = dma.hbm_to_smem %s2822_s0, 16, %s2437_s24, [#allocation2] }
   0x2   :  { %2425 = dma.done.wait [#allocation2], 16 }
   0x3   :  { %2426 = vsyncadd [#allocation2], 4294967280 }
   0x4   :  { %15 = sfence }
   0x5   :  { %16 = vsyncpa [#allocation5], 0 }
   0x6   :  { %17 = vsyncpa [#allocation8], 0 }
   0x7   :  { %18 = vsyncpa [#allocation11], 0 }
   0x8   :  { %19 = vsyncpa [#allocation14], 0 }
   0x9   :  { %20 = vsyncpa [#allocation6], 0  ;;  %s2438_s27 = smov [#allocation7]   ;;  %s2439_s29 = smov [#allocation10]  }
   0xa   :  { %s38_s28 = sshll.u32 %s2438_s27, 4  ;;  %s62_s30 = sshll.u32 %s2439_s29, 4  ;;  %s39_s28 = int_to_ptr.vmem [resolvable:$true] %s38_s28  ;;  %s63_s30 = int_to_ptr.vmem [resolvable:$true] %s62_s30 }
   0xb   :  { %s2293_s8 = scalar_lea.vmem %s39_s28, 128  ;;  %p2298_p1 = scmp.lt.s32.totalorder %s39_s28, %s39_s28 }
   0xc   :  { %p2294_p0 = scmp.ne.s32.totalorder %s39_s28, %s2293_s8  ;;  %p2299_p2 = scmp.lt.s32.totalorder %s2293_s8, %s2293_s8 }
   0xe   :  { %p2300_p3 = por %p2299_p2, %p2298_p1 }
  0x10   :  { %p2301_p4 = pnand %p2300_p3, %p2294_p0 }
  0x12   :  { %2304 = shalt.err (!%p2301_p4)
}
  0x13   :  { %s2440_s0 = smov 64   ;;  %s2441_s9 = smov 4  }
  0x14   :  { %44 = dma.hbm_to_vmem [thread:$0]  %s2824_s2, 128, %s39_s28, [#allocation8], %s2440_s0, %s2440_s0, %s2441_s9  }
  0x15   :  { %s2313_s12 = scalar_lea.vmem %s63_s30, 3072  ;;  %p2318_p6 = scmp.lt.s32.totalorder %s63_s30, %s63_s30 }
  0x16   :  { %p2314_p5 = scmp.ne.s32.totalorder %s63_s30, %s2313_s12  ;;  %p2319_p7 = scmp.lt.s32.totalorder %s2313_s12, %s2313_s12 }
  0x18   :  { %p2320_p8 = por %p2319_p7, %p2318_p6 }
  0x1a   :  { %p2321_p9 = pnand %p2320_p8, %p2314_p5 }
  0x1c   :  { %2324 = shalt.err (!%p2321_p9)
}
  0x1d   :  { %s2442_s13 = smov 192   ;;  %s2443_s14 = smov 12  }
  0x1e   :  { %68 = dma.hbm_to_vmem [thread:$0]  %s2826_s4, 3072, %s63_s30, [#allocation11], %s2442_s13, %s2442_s13, %s2443_s14  }
  0x1f   :  { %s2444_s17 = smov [#allocation4]   ;;  %s2445_s19 = smov [#allocation9]  }
  0x20   :  { %s26_s18 = sshll.u32 %s2444_s17, 4  ;;  %s50_s20 = sshll.u32 %s2445_s19, 4  ;;  %s27_s18 = int_to_ptr.vmem [resolvable:$true] %s26_s18  ;;  %s51_s20 = int_to_ptr.vmem [resolvable:$true] %s50_s20 }
  0x21   :  { %s2333_s2 = scalar_lea.vmem %s27_s18, 128  ;;  %p2338_p11 = scmp.lt.s32.totalorder %s27_s18, %s27_s18 }
  0x22   :  { %p2334_p10 = scmp.ne.s32.totalorder %s27_s18, %s2333_s2  ;;  %p2339_p12 = scmp.lt.s32.totalorder %s2333_s2, %s2333_s2 }
  0x24   :  { %p2340_p13 = por %p2339_p12, %p2338_p11 }
  0x26   :  { %p2341_p0 = pnand %p2340_p13, %p2334_p10 }
  0x28   :  { %2344 = shalt.err (!%p2341_p0)
}
  0x29   :  { %32 = dma.hbm_to_vmem [thread:$0]  %s2823_s1, 128, %s27_s18, [#allocation5], %s2440_s0, %s2440_s0, %s2441_s9  }
  0x2a   :  { %s2353_s4 = scalar_lea.vmem %s51_s20, 128  ;;  %p2358_p2 = scmp.lt.s32.totalorder %s51_s20, %s51_s20 }
  0x2b   :  { %p2354_p1 = scmp.ne.s32.totalorder %s51_s20, %s2353_s4  ;;  %p2359_p3 = scmp.lt.s32.totalorder %s2353_s4, %s2353_s4 }
  0x2d   :  { %p2360_p4 = por %p2359_p3, %p2358_p2 }
  0x2f   :  { %p2361_p5 = pnand %p2360_p4, %p2354_p1 }
  0x31   :  { %2364 = shalt.err (!%p2361_p5)
}
  0x32   :  { %56 = dma.hbm_to_vmem [thread:$0]  %s2825_s3, 128, %s51_s20, [#allocation8], %s2440_s0, %s2440_s0, %s2441_s9  }
  0x33   :  { %s2446_s25 = smov [#allocation12]   ;;  %s2447_s27 = smov [#allocation13]  }
  0x34   :  { %s74_s26 = sshll.u32 %s2446_s25, 4  ;;  %s86_s28 = sshll.u32 %s2447_s27, 4  ;;  %s75_s26 = int_to_ptr.vmem [resolvable:$true] %s74_s26  ;;  %s87_s28 = int_to_ptr.vmem [resolvable:$true] %s86_s28 }
  0x35   :  { %s2373_s1 = scalar_lea.vmem %s75_s26, 1024  ;;  %p2378_p7 = scmp.lt.s32.totalorder %s75_s26, %s75_s26 }
  0x36   :  { %p2374_p6 = scmp.ne.s32.totalorder %s75_s26, %s2373_s1  ;;  %p2379_p8 = scmp.lt.s32.totalorder %s2373_s1, %s2373_s1 }
  0x38   :  { %p2380_p9 = por %p2379_p8, %p2378_p7 }
  0x3a   :  { %p2381_p10 = pnand %p2380_p9, %p2374_p6 }
  0x3c   :  { %2384 = shalt.err (!%p2381_p10)
}
  0x3d   :  { %80 = dma.hbm_to_vmem [thread:$0]  %s2827_s5, 1024, %s75_s26, [#allocation11], %s2440_s0, %s2440_s0, %s2441_s9  }
  0x3e   :  { %s2393_s3 = scalar_lea.vmem %s87_s28, 1024  ;;  %p2398_p12 = scmp.lt.s32.totalorder %s87_s28, %s87_s28 }
  0x3f   :  { %p2394_p11 = scmp.ne.s32.totalorder %s87_s28, %s2393_s3  ;;  %p2399_p13 = scmp.lt.s32.totalorder %s2393_s3, %s2393_s3 }
  0x41   :  { %p2400_p0 = por %p2399_p13, %p2398_p12 }
  0x43   :  { %p2401_p1 = pnand %p2400_p0, %p2394_p11 }
  0x45   :  { %2404 = shalt.err (!%p2401_p1)
}
  0x46   :  { %92 = dma.hbm_to_vmem [thread:$0]  %s2828_s6, 1024, %s87_s28, [#allocation14], %s2440_s0, %s2440_s0, %s2441_s9  }
  0x47   :  { %2427 = dma.done.wait [#allocation5], 128  }
  0x48   :  { %2428 = vsyncadd [#allocation5], 4294967168 }
  0x49   :  { %2429 = dma.done.wait [#allocation8], 256  }
  0x4a   :  { %2430 = vsyncadd [#allocation8], 4294967040 }
  0x4b   :  { %2431 = dma.done.wait [#allocation11], 4096  }
  0x4c   :  { %2432 = vsyncadd [#allocation11], 4294963200 }
  0x4d   :  { %2433 = dma.done.wait [#allocation14], 1024  }
  0x4e   :  { %2434 = vsyncadd [#allocation14], 4294966272  ;;  %v2448_v0 = vmov 0   ;;  %v2449_v1 = vmov 0.0   ;;  %v2195_v2 = vld [vmem:[#allocation10 + $0xac] ss:$12 sps:$4 sm:$0xff]   ;;  %v387_v56 = vlaneseq }
  0x4f   :  { %313 = vmatprep.mubr.bf16.mxu0 %v2448_v0  ;;  %1976 = vmatprep.subr.bf16.mxu1 %v2449_v1  ;;  %v2197_v3 = vld [vmem:[#allocation10 + $0xa8] ss:$12 sps:$4 sm:$0xff]   ;;  %v2200_v5 = vld [vmem:[#allocation10 + $0x90] ss:$12 sps:$4 sm:$0xff]   ;;  %v2203_v7 = vld [vmem:[#allocation10 + $0x78] ss:$12 sps:$4 sm:$0xff]  }
  0x50   :  { %281 = vmatprep.subr.bf16.mxu0 %v2195_v2  ;;  %v2198_v4 = vld [vmem:[#allocation10 + $0x94] ss:$12 sps:$4 sm:$0xff]   ;;  %v2201_v6 = vld [vmem:[#allocation10 + $0x7c] ss:$12 sps:$4 sm:$0xff]   ;;  %v2204_v8 = vld [vmem:[#allocation10 + $0x64] ss:$12 sps:$4 sm:$0xff]  }
  0x51   :  { %282 = vmatpush1.bf16.msra.mxu0 %v2197_v3  ;;  %v2206_v9 = vld [vmem:[#allocation10 + $0x60] ss:$12 sps:$4 sm:$0xff]   ;;  %v2220_v10 = vld [vmem:[#allocation10 + $0xb0] ss:$12 sps:$4 sm:$0xff]   ;;  %v2209_v12 = vld [vmem:[#allocation10 + $0x48] ss:$12 sps:$4 sm:$0xff]  }
  0x52   :  { %283 = vmatprep.subr.bf16.mxu0 %v2198_v4  ;;  %v2207_v11 = vld [vmem:[#allocation10 + $0x4c] ss:$12 sps:$4 sm:$0xff]   ;;  %1977 = vmatpush3.bf16.msra.mxu1 %v2220_v10  ;;  %v2210_v14 = vld [vmem:[#allocation10 + $0x34] ss:$12 sps:$4 sm:$0xff]   ;;  %v2212_v16 = vld [vmem:[#allocation10 + $0x30] ss:$12 sps:$4 sm:$0xff]  }
  0x53   :  { %v2221_v13 = vld [vmem:[#allocation10 + $0x98] ss:$12 sps:$4 sm:$0xff]   ;;  %1978 = vmatprep.subr.bf16.mxu1 %v2449_v1  ;;  %v2222_v15 = vld [vmem:[#allocation10 + $0x80] ss:$12 sps:$4 sm:$0xff]   ;;  %v2213_v17 = vld [vmem:[#allocation10 + $0x1c] ss:$12 sps:$4 sm:$0xff]  }
  0x54   :  { %v2223_v18 = vld [vmem:[#allocation10 + $0x68] ss:$12 sps:$4 sm:$0xff]   ;;  %v2215_v19 = vld [vmem:[#allocation10 + $0x18] ss:$12 sps:$4 sm:$0xff]   ;;  %v2224_v21 = vld [vmem:[#allocation10 + $0x50] ss:$12 sps:$4 sm:$0xff]  }
  0x55   :  { %284 = vmatpush1.bf16.msra.mxu0 %v2200_v5  ;;  %v2216_v20 = vld [vmem:[#allocation10 + $0x4] ss:$12 sps:$4 sm:$0xff]   ;;  %v2218_v22 = vld [vmem:[#allocation10] ss:$12 sps:$4 sm:$0xff]   ;;  %v2227_v26 = vld [vmem:[#allocation10 + $0x8] ss:$12 sps:$4 sm:$0xff]  }
  0x56   :  { %285 = vmatprep.subr.bf16.mxu0 %v2201_v6  ;;  %1979 = vmatpush3.bf16.msra.mxu1 %v2221_v13  ;;  %v2536_v23 = vld [vmem:[#allocation4] sm:$0xff]   ;;  %v2225_v24 = vld [vmem:[#allocation10 + $0x38] ss:$12 sps:$4 sm:$0xff]   ;;  %vm2450_vm0 = vmmov 0   ;;  %v370_v32 = vld [vmem:[#allocation7] sm:$0xf] }
  0x57   :  { %1980 = vmatprep.subr.bf16.mxu1 %v2449_v1  ;;  %v2226_v25 = vld [vmem:[#allocation10 + $0x20] ss:$12 sps:$4 sm:$0xff]   ;;  %1992 = vmatprep.mubr.msk.bf16.mxu1 %vm2450_vm0, %v2449_v1  ;;  %vm376_vm1 = vcmask 1043456   ;;  %vm400_vm2 = vcmask 261120   ;;  %s2451_s5 = smov 96   ;;  %s2452_s6 = smov 32  }
  0x58   :  { %v372_v45 = vld [vmem:[#allocation9] sm:$0xf]  ;;  %s386_s9 = sld [smem:[#allocation3]]  ;;  %v2596_v57 = vand.u32 127, %v387_v56  ;;  %v388_v58 = vshrl.u32 %v387_v56, 7  ;;  %vm602_vm10 = vcmask 130048  }
  0x59   :  { %286 = vmatpush1.bf16.msra.mxu0 %v2203_v7  ;;  %s1881_s11 = sld [smem:[#allocation3 + $0x1]] }
  0x5a   :  { %287 = vmatprep.subr.bf16.mxu0 %v2204_v8  ;;  %1981 = vmatpush3.bf16.msra.mxu1 %v2222_v15  ;;  %v2599_v59 = vadd.s32 4294967288, %v2596_v57  ;;  %vm393_vm3 = vcmp.ge.s32.totalorder %v2596_v57, 8  ;;  %vm392_vm7 = vcmp.lt.s32.totalorder %v2596_v57, 4 }
  0x5b   :  { %1982 = vmatprep.subr.bf16.mxu1 %v2449_v1 }
  0x5c   :  { %vm394_vm4 = vcmp.le.s32.totalorder %v2599_v59, %v388_v58 }
  0x5d   :  { %288 = vmatpush1.bf16.msra.mxu0 %v2206_v9  ;;  %vm2603_vm5 = vmand %vm393_vm3, %vm394_vm4 }
  0x5e   :  { %289 = vmatprep.subr.bf16.mxu0 %v2207_v11  ;;  %1983 = vmatpush3.bf16.msra.mxu1 %v2223_v18  ;;  %v396_v60 = vstv %s386_s9 }
  0x5f   :  { %1984 = vmatprep.subr.bf16.mxu1 %v2449_v1  ;;  %vm397_vm6 = vcmp.lt.s32.totalorder %v2599_v59, %v396_v60 }
  0x60   :  { %vm398_vm8 = vmand %vm2603_vm5, %vm397_vm6 }
  0x61   :  { %290 = vmatpush1.bf16.msra.mxu0 %v2209_v12  ;;  %vm2613_vm9 = vmor %vm392_vm7, %vm398_vm8 }
  0x62   :  { %291 = vmatprep.subr.bf16.mxu0 %v2210_v14  ;;  %1985 = vmatpush3.bf16.msra.mxu1 %v2224_v21 }
  0x63   :  { %1986 = vmatprep.subr.bf16.mxu1 %v2449_v1 }
  0x65   :  { %292 = vmatpush1.bf16.msra.mxu0 %v2212_v16 }
  0x66   :  { %293 = vmatprep.subr.bf16.mxu0 %v2213_v17  ;;  %1987 = vmatpush3.bf16.msra.mxu1 %v2225_v24 }
  0x67   :  { %1988 = vmatprep.subr.bf16.mxu1 %v2449_v1 }
  0x69   :  { %294 = vmatpush1.bf16.msra.mxu0 %v2215_v19 }
  0x6a   :  { %295 = vmatprep.subr.bf16.mxu0 %v2216_v20  ;;  %1989 = vmatpush3.bf16.msra.mxu1 %v2226_v25 }
  0x6b   :  { %1990 = vmatprep.subr.bf16.mxu1 %v2449_v1 }
  0x6d   :  { %296 = vmatpush1.bf16.msra.mxu0 %v2218_v22 }
  0x6e   :  { %2020 = vmatprep.subr.bf16.mxu0 %v2449_v1  ;;  %1991 = vmatpush3.bf16.msra.mxu1 %v2227_v26 }
  0x6f   :  { %1996 = vmatprep.subr.bf16.mxu1 %v2449_v1 }
  0x70   :  { %314 = vmatmul.mubr.bf16.vlgmr.msra.gmra.mxu0 %v2536_v23 }
  0x71   :  { %2022 = vmatprep.mubr.msk.bf16.mxu0 %vm2450_vm0, %v2449_v1  ;;  %1993 = vmatmul.mubr.bf16.vlgmr.msra.gmra.mxu1 %v2536_v23 }
  0x72   :  { %1998 = vmatprep.mubr.msk.bf16.mxu1 %vm2450_vm0, %v2449_v1 }
 0x130   :  { %v315_v27 = vpop.f32.mrf.mxu0 }
 0x131   :  { %v365_v36 = vmul.f32 0.17677669, %v315_v27  ;;  %v358_v39 = vpop.f32.mrf.mxu1 }
 0x132   :  { %v317_v28 = vpop.f32.mrf.mxu0 }
 0x133   :  { %v1994_v40 = vpop.f32.mrf.mxu1 }
 0x134   :  { %v319_v29 = vpop.f32.mrf.mxu0 }
 0x135   :  { %v366_v34 = vmul.f32 0.17677669, %v319_v29  ;;  %v361_v41 = vpop.f32.mrf.mxu1 }
 0x136   :  { %v321_v30 = vpop.f32.mrf.mxu0  ;;  %v2573_v43 = vpack.c.bf16 %v361_v41, %v358_v39 }
 0x137   :  { %v2552_v31 = vpack.c.bf16 %v321_v30, %v317_v28  ;;  %v2559_v38 = vpack.c.bf16 %v366_v34, %v365_v36  ;;  %v1995_v42 = vpop.f32.mrf.mxu1 }
 0x138   :  { %v381_v44 = vrot.slane %v2573_v43, 4 }
 0x139   :  { %v375_v33 = vrot.slane %v2552_v31, 4 }
 0x13a   :  { %v2577_v46 = vsel %vm376_vm1, %v372_v45, %v381_v44 }
 0x13b   :  { %v379_v35 = vsel %vm376_vm1, %v370_v32, %v375_v33  ;;  %2021 = vmatpush3.bf16.msra.mxu0 %v2577_v46 }
 0x13c   :  { %502 = vrot.lane.b32.xlu1 %v379_v35, %s2440_s0  ;;  %451 = vrot.lane.b32.xlu0 %v379_v35, %s2451_s5  ;;  %v404_v37 = vsel %vm400_vm2, %v379_v35, 0 }
 0x13d   :  { %1997 = vmatpush3.bf16.xpose.msra.mxu1 %v404_v37  ;;  %2034 = vmatprep.subr.bf16.mxu0 %v2449_v1 }
 0x13e   :  { %2002 = vmatprep.subr.bf16.mxu1 %v2449_v1 }
 0x140   :  { %500 = vrot.lane.b32.xlu1 %v2559_v38, %s2440_s0  ;;  %448 = vrot.lane.b32.xlu0 %v2559_v38, %s2451_s5 }
 0x144   :  { %551 = vrot.lane.b32.xlu1 %v2559_v38, %s2452_s6  ;;  %553 = vrot.lane.b32.xlu0 %v379_v35, %s2452_s6 }
 0x145   :  { %1999 = vmatmul.mubr.msk.bf16.vlgmr.msra.gmra.mxu1 %vm400_vm2, %v2559_v38 }
 0x146   :  { %2004 = vmatprep.mubr.msk.bf16.mxu1 %vm2450_vm0, %v2449_v1 }
 0x1ae   :  { %v452_v47 = vpop.permute.xlu0 %451  ;;  %v503_v49 = vpop.permute.xlu1 %502 }
 0x1af   :  { %v457_v48 = vsel %vm400_vm2, %v452_v47, 0  ;;  %v508_v51 = vsel %vm400_vm2, %v503_v49, 0  ;;  %v371_v49 = vld [vmem:[#allocation7 + $0x4] sm:$0xf] }
 0x1b0   :  { %2003 = vmatpush3.bf16.xpose.msra.mxu1 %v457_v48 }
 0x1b1   :  { %2008 = vmatprep.subr.bf16.mxu1 %v2449_v1 }
 0x1b2   :  { %v449_v50 = vpop.permute.xlu0 %448  ;;  %v501_v53 = vpop.permute.xlu1 %500 }
 0x1b6   :  { %v554_v52 = vpop.permute.xlu0 %553  ;;  %v552_v55 = vpop.permute.xlu1 %551 }
 0x1b7   :  { %2005 = vmatmul.mubr.msk.bf16.vlgmr.msra.gmra.mxu1 %vm400_vm2, %v449_v50  ;;  %v559_v54 = vsel %vm400_vm2, %v554_v52, 0  ;;  %v1082_v50 = vsel %vm376_vm1, %v371_v49, %v2552_v31  ;;  %v2648_v52 = vld [vmem:[#allocation12 + $0x8] sm:$0xff]   ;;  %v2651_v31 = vld [vmem:[#allocation12] sm:$0xff]  }
 0x1b8   :  { %2009 = vmatpush3.bf16.xpose.msra.mxu1 %v508_v51  ;;  %2010 = vmatprep.mubr.msk.bf16.mxu1 %vm2450_vm0, %v2449_v1  ;;  %v1093_v51 = vrot.slane %v2559_v38, 4 }
 0x1b9   :  { %2014 = vmatprep.subr.bf16.mxu1 %v2449_v1 }
 0x1bf   :  { %2011 = vmatmul.mubr.msk.bf16.vlgmr.msra.gmra.mxu1 %vm400_vm2, %v501_v53 }
 0x1c0   :  { %2015 = vmatpush3.bf16.xpose.msra.mxu1 %v559_v54  ;;  %2016 = vmatprep.mubr.msk.bf16.mxu1 %vm2450_vm0, %v2449_v1 }
 0x1c1   :  { %2026 = vmatprep.subr.bf16.mxu1 %v2449_v1 }
 0x1c7   :  { %2017 = vmatmul.mubr.msk.bf16.vlgmr.msra.gmra.mxu1 %vm400_vm2, %v552_v55 }
 0x1c8   :  { %2030 = vmatprep.mubr.msk.bf16.mxu1 %vm2450_vm0, %v2449_v1  ;;  %2027 = vmatpush3.bf16.msra.mxu1 %v2648_v52 }
 0x1c9   :  { %2028 = vmatprep.subr.bf16.mxu1 %v2449_v1 }
 0x1cc   :  { %2029 = vmatpush3.bf16.msra.mxu1 %v2651_v31 }
 0x1cd   :  { %2040 = vmatprep.subr.bf16.mxu1 %v2449_v1 }
 0x205   :  { %v440_v63 = vpop.f32.mrf.mxu1 }
 0x206   :  { %v446_v0 = vsel %vm2613_vm9, %v440_v63, -1e+09 }
 0x207   :  { %v2000_v2 = vpop.f32.mrf.mxu1  ;;  %v603_v3 = vsel %vm602_vm10, %v446_v0, -inf }
 0x208   :  { %604 = vmax.xlane.f32.xlu0 %v603_v3 }
 0x209   :  { %v443_v4 = vpop.f32.mrf.mxu1 }
 0x20b   :  { %v2001_v5 = vpop.f32.mrf.mxu1 }
 0x277   :  { %v493_v6 = vpop.f32.mrf.mxu1 }
 0x278   :  { %v499_v7 = vsel %vm2613_vm9, %v493_v6, -1e+09 }
 0x279   :  { %v2006_v8 = vpop.f32.mrf.mxu1  ;;  %v606_v9 = vsel %vm602_vm10, %v499_v7, -inf }
 0x27a   :  { %607 = vmax.xlane.f32.xlu1 %v606_v9 }
 0x27b   :  { %v496_v10 = vpop.f32.mrf.mxu1 }
 0x27d   :  { %v2007_v11 = vpop.f32.mrf.mxu1 }
 0x27e   :  { %v1097_v11 = vsel %vm400_vm2, %v1082_v50, 0 }
 0x27f   :  { %v544_v12 = vpop.f32.mrf.mxu1 }
 0x280   :  { %v550_v13 = vsel %vm2613_vm9, %v544_v12, -1e+09 }
 0x281   :  { %v2012_v14 = vpop.f32.mrf.mxu1  ;;  %v609_v15 = vsel %vm602_vm10, %v550_v13, -inf }
 0x282   :  { %610 = vmax.xlane.f32.xlu0 %v609_v15  ;;  %v373_v14 = vld [vmem:[#allocation9 + $0x4] sm:$0xf] }
 0x283   :  { %v547_v16 = vpop.f32.mrf.mxu1 }
 0x284   :  { %v2683_v16 = vsel %vm376_vm1, %v373_v14, %v2573_v43 }
 0x285   :  { %v2013_v17 = vpop.f32.mrf.mxu1 }
 0x287   :  { %v595_v18 = vpop.f32.mrf.mxu1 }
 0x288   :  { %v601_v19 = vsel %vm2613_vm9, %v595_v18, -1e+09  ;;  %v2689_v18 = vld [vmem:[#allocation12 + $0x18] sm:$0xff]  }
 0x289   :  { %v2018_v20 = vpop.f32.mrf.mxu1  ;;  %v612_v21 = vsel %vm602_vm10, %v601_v19, -inf }
 0x28a   :  { %613 = vmax.xlane.f32.xlu0 %v612_v21 }
 0x28b   :  { %v598_v22 = vpop.f32.mrf.mxu1 }
 0x28c   :  { %v2693_v22 = vld [vmem:[#allocation12 + $0x10] sm:$0xff]  }
 0x28d   :  { %v2019_v24 = vpop.f32.mrf.mxu1 }
 0x291   :  { %v605_v25 = vpop.xlane.xlu0 %604 }
 0x292   :  { %v615_v26 = vsub.f32 %v446_v0, %v605_v25  ;;  %v2699_v25 = vld [vmem:[#allocation12 + $0x28] sm:$0xff]  }
 0x294   :  { %v619_v27 = vmul.f32 1.442695, %v615_v26 }
 0x296   :  { %2245 = vpow2.f32 %v619_v27 }
 0x2a3   :  { %v2246_v28 = vpop.eup %2245 }
 0x2a4   :  { %v627_v29 = vsel %vm602_vm10, %v2246_v28, 0.0 }
 0x2a5   :  { %628 = vadd.xlane.f32.xlu1 %v627_v29  ;;  %v2704_v29 = vld [vmem:[#allocation12 + $0x20] sm:$0xff]  }
 0x2b6   :  { %757 = vrot.lane.b32.xlu1 %v2577_v46, %s2451_s5 }
 0x303   :  { %v608_v30 = vpop.xlane.xlu1 %607 }
 0x304   :  { %v616_v32 = vsub.f32 %v499_v7, %v608_v30 }
 0x306   :  { %v621_v33 = vmul.f32 1.442695, %v616_v32 }
 0x308   :  { %2247 = vpow2.f32 %v621_v33  ;;  %v2710_v33 = vld [vmem:[#allocation12 + $0x38] sm:$0xff]  }
 0x30b   :  { %v611_v34 = vpop.xlane.xlu0 %610 }
 0x30c   :  { %v617_v35 = vsub.f32 %v550_v13, %v611_v34 }
 0x30e   :  { %v623_v36 = vmul.f32 1.442695, %v617_v35 }
 0x310   :  { %2249 = vpow2.f32 %v623_v36 }
 0x313   :  { %v614_v37 = vpop.xlane.xlu0 %613 }
 0x314   :  { %v618_v39 = vsub.f32 %v601_v19, %v614_v37  ;;  %v2715_v37 = vld [vmem:[#allocation12 + $0x30] sm:$0xff]  }
 0x315   :  { %v2248_v40 = vpop.eup %2247 }
 0x316   :  { %v625_v41 = vmul.f32 1.442695, %v618_v39  ;;  %v630_v42 = vsel %vm602_vm10, %v2248_v40, 0.0  ;;  %v1089_v39 = vstv %s1881_s11 }
 0x317   :  { %631 = vadd.xlane.f32.xlu0 %v630_v42  ;;  %vm1090_vm11 = vcmp.lt.s32.totalorder %v2599_v59, %v1089_v39 }
 0x318   :  { %2251 = vpow2.f32 %v625_v41  ;;  %vm1091_vm12 = vmand %vm2603_vm5, %vm1090_vm11 }
 0x319   :  { %vm2733_vm13 = vmor %vm392_vm7, %vm1091_vm12 }
 0x31d   :  { %v2250_v44 = vpop.eup %2249 }
 0x31e   :  { %v633_v45 = vsel %vm602_vm10, %v2250_v44, 0.0 }
 0x31f   :  { %634 = vadd.xlane.f32.xlu1 %v633_v45 }
 0x325   :  { %v2252_v47 = vpop.eup %2251 }
 0x326   :  { %v636_v48 = vsel %vm602_vm10, %v2252_v47, 0.0 }
 0x327   :  { %637 = vadd.xlane.f32.xlu0 %v636_v48 }
 0x32e   :  { %v629_v38 = vpop.xlane.xlu1 %628 }
 0x32f   :  { %2253 = vrcp.f32 %v629_v38 }
 0x330   :  { %973 = vrot.lane.b32.xlu1 %v2577_v46, %s2452_s6 }
 0x332   :  { %v758_v53 = vpop.permute.xlu1 %757 }
 0x334   :  { %1143 = vrot.lane.b32.xlu1 %v1082_v50, %s2451_s5 }
 0x338   :  { %1194 = vrot.lane.b32.xlu1 %v1082_v50, %s2440_s0 }
 0x33c   :  { %1192 = vrot.lane.b32.xlu1 %v1093_v51, %s2440_s0  ;;  %v2254_v54 = vpop.eup %2253 }
 0x33d   :  { %864 = vrot.lane.b32.xlu0 %v2577_v46, %s2440_s0  ;;  %v643_v58 = vmul.f32 %v2254_v54, %v2246_v28 }
 0x341   :  { %1140 = vrot.lane.b32.xlu0 %v1093_v51, %s2451_s5 }
 0x345   :  { %1245 = vrot.lane.b32.xlu0 %v1082_v50, %s2452_s6 }
 0x349   :  { %1243 = vrot.lane.b32.xlu0 %v1093_v51, %s2452_s6 }
 0x3a0   :  { %v632_v46 = vpop.xlane.xlu0 %631 }
 0x3a1   :  { %2255 = vrcp.f32 %v632_v46 }
 0x3a8   :  { %v635_v55 = vpop.xlane.xlu1 %634 }
 0x3a9   :  { %2257 = vrcp.f32 %v635_v55 }
 0x3ac   :  { %v974_v8 = vpop.permute.xlu1 %973 }
 0x3ae   :  { %v2256_v56 = vpop.eup %2255 }
 0x3af   :  { %v644_v60 = vmul.f32 %v2256_v56, %v2248_v40 }
 0x3b0   :  { %v638_v62 = vpop.xlane.xlu0 %637  ;;  %v2668_v10 = vpop.permute.xlu1 %1143 }
 0x3b1   :  { %2259 = vrcp.f32 %v638_v62  ;;  %v647_v63 = vpack.c.bf16 %v644_v60, %v643_v58 }
 0x3b3   :  { %2023 = vmatmul.mubr.msk.bf16.vlgmr.msra.gmra.mxu0 %vm602_vm10, %v647_v63  ;;  %v755_v0 = vrot.slane %v647_v63, 4 }
 0x3b4   :  { %2035 = vmatpush3.bf16.msra.mxu0 %v758_v53  ;;  %2036 = vmatprep.mubr.msk.bf16.mxu0 %vm2450_vm0, %v2449_v1  ;;  %v865_v2 = vpop.permute.xlu0 %864  ;;  %v1195_v12 = vpop.permute.xlu1 %1194 }
 0x3b5   :  { %2048 = vmatprep.subr.bf16.mxu0 %v2449_v1  ;;  %v1200_v13 = vsel %vm400_vm2, %v1195_v12, 0 }
 0x3b6   :  { %v2258_v3 = vpop.eup %2257 }
 0x3b7   :  { %v645_v5 = vmul.f32 %v2258_v3, %v2250_v44 }
 0x3b8   :  { %v1193_v15 = vpop.permute.xlu1 %1192  ;;  %v1141_v44 = vpop.permute.xlu0 %1140 }
 0x3bb   :  { %2037 = vmatmul.mubr.msk.bf16.vlgmr.msra.gmra.mxu0 %vm602_vm10, %v755_v0 }
 0x3bc   :  { %2049 = vmatpush3.bf16.msra.mxu0 %v865_v2  ;;  %2050 = vmatprep.mubr.msk.bf16.mxu0 %vm2450_vm0, %v2449_v1  ;;  %v1246_v50 = vpop.permute.xlu0 %1245  ;;  %v649_v2 = vunpack.c.l.bf16 %v2536_v23 }
 0x3bd   :  { %2062 = vmatprep.subr.bf16.mxu0 %v2449_v1  ;;  %v1251_v53 = vsel %vm400_vm2, %v1246_v50, 0 }
 0x3be   :  { %v2260_v4 = vpop.eup %2259 }
 0x3bf   :  { %v646_v6 = vmul.f32 %v2260_v4, %v2252_v47  ;;  %v1149_v47 = vsel %vm400_vm2, %v2668_v10, 0 }
 0x3c0   :  { %v1244_v56 = vpop.permute.xlu0 %1243 }
 0x3c1   :  { %v648_v7 = vpack.c.bf16 %v646_v6, %v645_v5 }
 0x3c3   :  { %2051 = vmatmul.mubr.msk.bf16.vlgmr.msra.gmra.mxu0 %vm602_vm10, %v648_v7  ;;  %v972_v9 = vrot.slane %v648_v7, 4 }
 0x3c4   :  { %2063 = vmatpush3.bf16.msra.mxu0 %v974_v8  ;;  %2064 = vmatprep.mubr.msk.bf16.mxu0 %vm2450_vm0, %v2449_v1 }
 0x3c5   :  { %2076 = vmatprep.subr.bf16.mxu0 %v2449_v1 }
 0x3cb   :  { %2065 = vmatmul.mubr.msk.bf16.vlgmr.msra.gmra.mxu0 %vm602_vm10, %v972_v9 }
 0x3cc   :  { %2077 = vmatpush3.bf16.xpose.msra.mxu0 %v1097_v11  ;;  %2078 = vmatprep.mubr.msk.bf16.mxu0 %vm2450_vm0, %v2449_v1 }
 0x3cd   :  { %2088 = vmatprep.subr.bf16.mxu0 %v2449_v1 }
 0x3d3   :  { %2079 = vmatmul.mubr.msk.bf16.vlgmr.msra.gmra.mxu0 %vm400_vm2, %v1093_v51 }
 0x3d4   :  { %2089 = vmatpush3.bf16.xpose.msra.mxu0 %v1200_v13  ;;  %2090 = vmatprep.mubr.msk.bf16.mxu0 %vm2450_vm0, %v2449_v1 }
 0x3d5   :  { %2100 = vmatprep.subr.bf16.mxu0 %v2449_v1 }
 0x3db   :  { %2091 = vmatmul.mubr.msk.bf16.vlgmr.msra.gmra.mxu0 %vm400_vm2, %v1193_v15 }
 0x3dc   :  { %2101 = vmatpush3.bf16.msra.mxu0 %v2683_v16  ;;  %2102 = vmatprep.mubr.msk.bf16.mxu0 %vm2450_vm0, %v2449_v1 }
 0x3dd   :  { %2114 = vmatprep.subr.bf16.mxu0 %v2449_v1 }
 0x473   :  { %v687_v17 = vpop.f32.mrf.mxu0 }
 0x474   :  { %v693_v19 = vpack.c.bf16 %v687_v17, %v687_v17 }
 0x475   :  { %v2024_v20 = vpop.f32.mrf.mxu0 }
 0x476   :  { %2031 = vmatmul.mubr.msk.bf16.vlgmr.msra.gmra.mxu1 %vm400_vm2, %v693_v19 }
 0x477   :  { %2041 = vmatpush3.bf16.msra.mxu1 %v2689_v18  ;;  %v690_v21 = vpop.f32.mrf.mxu0  ;;  %2044 = vmatprep.mubr.msk.bf16.mxu1 %vm2450_vm0, %v2449_v1 }
 0x478   :  { %2042 = vmatprep.subr.bf16.mxu1 %v2449_v1 }
 0x479   :  { %v2025_v43 = vpop.f32.mrf.mxu0 }
 0x47b   :  { %2043 = vmatpush3.bf16.msra.mxu1 %v2693_v22  ;;  %v797_v24 = vpop.f32.mrf.mxu0 }
 0x47c   :  { %v803_v26 = vpack.c.bf16 %v797_v24, %v797_v24  ;;  %2054 = vmatprep.subr.bf16.mxu1 %v2449_v1 }
 0x47d   :  { %v2038_v27 = vpop.f32.mrf.mxu0 }
 0x47e   :  { %2045 = vmatmul.mubr.msk.bf16.vlgmr.msra.gmra.mxu1 %vm400_vm2, %v803_v26 }
 0x47f   :  { %2055 = vmatpush3.bf16.msra.mxu1 %v2699_v25  ;;  %v800_v28 = vpop.f32.mrf.mxu0  ;;  %2058 = vmatprep.mubr.msk.bf16.mxu1 %vm2450_vm0, %v2449_v1 }
 0x480   :  { %2056 = vmatprep.subr.bf16.mxu1 %v2449_v1 }
 0x481   :  { %v2039_v30 = vpop.f32.mrf.mxu0 }
 0x483   :  { %2057 = vmatpush3.bf16.msra.mxu1 %v2704_v29  ;;  %v904_v32 = vpop.f32.mrf.mxu0 }
 0x484   :  { %v910_v34 = vpack.c.bf16 %v904_v32, %v904_v32  ;;  %2068 = vmatprep.subr.bf16.mxu1 %v2449_v1 }
 0x485   :  { %v2052_v35 = vpop.f32.mrf.mxu0 }
 0x486   :  { %2059 = vmatmul.mubr.msk.bf16.vlgmr.msra.gmra.mxu1 %vm400_vm2, %v910_v34 }
 0x487   :  { %2069 = vmatpush3.bf16.msra.mxu1 %v2710_v33  ;;  %v907_v36 = vpop.f32.mrf.mxu0  ;;  %2072 = vmatprep.mubr.msk.bf16.mxu1 %vm2450_vm0, %v2449_v1 }
 0x488   :  { %2070 = vmatprep.subr.bf16.mxu1 %v2449_v1 }
 0x489   :  { %v2053_v40 = vpop.f32.mrf.mxu0 }
 0x48b   :  { %2071 = vmatpush3.bf16.msra.mxu1 %v2715_v37  ;;  %v1013_v41 = vpop.f32.mrf.mxu0 }
 0x48c   :  { %v1019_v42 = vpack.c.bf16 %v1013_v41, %v1013_v41  ;;  %2082 = vmatprep.subr.bf16.mxu1 %v2449_v1 }
 0x48d   :  { %v2066_v45 = vpop.f32.mrf.mxu0 }
 0x48e   :  { %2073 = vmatmul.mubr.msk.bf16.vlgmr.msra.gmra.mxu1 %vm400_vm2, %v1019_v42 }
 0x48f   :  { %2083 = vmatpush3.bf16.xpose.msra.mxu1 %v1149_v47  ;;  %v1016_v48 = vpop.f32.mrf.mxu0  ;;  %2084 = vmatprep.mubr.msk.bf16.mxu1 %vm2450_vm0, %v2449_v1 }
 0x490   :  { %2094 = vmatprep.subr.bf16.mxu1 %v2449_v1 }
 0x491   :  { %v2067_v59 = vpop.f32.mrf.mxu0 }
 0x493   :  { %v1133_v51 = vpop.f32.mrf.mxu0 }
 0x494   :  { %v1139_v61 = vsel %vm2733_vm13, %v1133_v51, -1e+09 }
 0x495   :  { %v2080_v38 = vpop.f32.mrf.mxu0  ;;  %v1294_v46 = vsel %vm602_vm10, %v1139_v61, -inf }
 0x496   :  { %1295 = vmax.xlane.f32.xlu1 %v1294_v46  ;;  %2085 = vmatmul.mubr.msk.bf16.vlgmr.msra.gmra.mxu1 %vm400_vm2, %v1141_v44 }
 0x497   :  { %2095 = vmatpush3.bf16.xpose.msra.mxu1 %v1251_v53  ;;  %v1136_v54 = vpop.f32.mrf.mxu0  ;;  %2096 = vmatprep.mubr.msk.bf16.mxu1 %vm2450_vm0, %v2449_v1 }
 0x498   :  { %2106 = vmatprep.subr.bf16.mxu1 %v2449_v1 }
 0x499   :  { %v2081_v57 = vpop.f32.mrf.mxu0 }
 0x49b   :  { %v1236_v55 = vpop.f32.mrf.mxu0 }
 0x49c   :  { %v1242_v32 = vsel %vm2733_vm13, %v1236_v55, -1e+09 }
 0x49d   :  { %v2092_v58 = vpop.f32.mrf.mxu0  ;;  %v1300_v36 = vsel %vm602_vm10, %v1242_v32, -inf }
 0x49e   :  { %2097 = vmatmul.mubr.msk.bf16.vlgmr.msra.gmra.mxu1 %vm400_vm2, %v1244_v56 }
 0x49f   :  { %v1239_v60 = vpop.f32.mrf.mxu0  ;;  %2107 = vmatpush3.bf16.msra.mxu1 %v2648_v52  ;;  %2110 = vmatprep.mubr.msk.bf16.mxu1 %vm2450_vm0, %v2449_v1 }
 0x4a0   :  { %2108 = vmatprep.subr.bf16.mxu1 %v2449_v1 }
 0x4a1   :  { %v2093_v62 = vpop.f32.mrf.mxu0 }
 0x4a3   :  { %2109 = vmatpush3.bf16.msra.mxu1 %v2651_v31 }
 0x4a4   :  { %2120 = vmatprep.subr.bf16.mxu1 %v2449_v1 }
 0x51f   :  { %v1296_v10 = vpop.xlane.xlu1 %1295 }
 0x520   :  { %v1306_v13 = vsub.f32 %v1139_v61, %v1296_v10 }
 0x522   :  { %v1310_v15 = vmul.f32 1.442695, %v1306_v13 }
 0x524   :  { %2261 = vpow2.f32 %v1310_v15 }
 0x531   :  { %v2262_v39 = vpop.eup %2261 }
 0x532   :  { %v1318_v44 = vsel %vm602_vm10, %v2262_v39, 0.0 }
 0x536   :  { %v747_v63 = vpop.f32.mrf.mxu1 }
 0x537   :  { %v753_v5 = vadd.f32 %v747_v63, %v649_v2 }
 0x538   :  { %v2032_v0 = vpop.f32.mrf.mxu1 }
 0x53a   :  { %v750_v3 = vpop.f32.mrf.mxu1 }
 0x53c   :  { %v2033_v4 = vpop.f32.mrf.mxu1 }
 0x53e   :  { %v857_v6 = vpop.f32.mrf.mxu1 }
 0x53f   :  { %v863_v7 = vadd.f32 %v857_v6, %v753_v5 }
 0x540   :  { %v2046_v52 = vpop.f32.mrf.mxu1 }
 0x542   :  { %v860_v8 = vpop.f32.mrf.mxu1 }
 0x544   :  { %v2047_v9 = vpop.f32.mrf.mxu1 }
 0x546   :  { %v964_v11 = vpop.f32.mrf.mxu1 }
 0x547   :  { %v970_v12 = vadd.f32 %v964_v11, %v863_v7 }
 0x548   :  { %v2060_v14 = vpop.f32.mrf.mxu1 }
 0x54a   :  { %v967_v31 = vpop.f32.mrf.mxu1 }
 0x54c   :  { %v2061_v17 = vpop.f32.mrf.mxu1 }
 0x54e   :  { %v1073_v19 = vpop.f32.mrf.mxu1 }
 0x54f   :  { %v2753_v20 = vadd.f32 %v1073_v19, %v970_v12 }
 0x550   :  { %v2074_v21 = vpop.f32.mrf.mxu1 }
 0x552   :  { %v1076_v43 = vpop.f32.mrf.mxu1 }
 0x554   :  { %v2075_v24 = vpop.f32.mrf.mxu1 }
 0x556   :  { %v1185_v26 = vpop.f32.mrf.mxu1 }
 0x557   :  { %v1191_v27 = vsel %vm2733_vm13, %v1185_v26, -1e+09 }
 0x558   :  { %v2086_v28 = vpop.f32.mrf.mxu1  ;;  %v1297_v30 = vsel %vm602_vm10, %v1191_v27, -inf }
 0x559   :  { %1298 = vmax.xlane.f32.xlu0 %v1297_v30 }
 0x55a   :  { %v1188_v34 = vpop.f32.mrf.mxu1 }
 0x55c   :  { %v2087_v35 = vpop.f32.mrf.mxu1 }
 0x55d   :  { %1301 = vmax.xlane.f32.xlu0 %v1300_v36 }
 0x55e   :  { %v1287_v40 = vpop.f32.mrf.mxu1 }
 0x55f   :  { %v1293_v41 = vsel %vm2733_vm13, %v1287_v40, -1e+09 }
 0x560   :  { %v2098_v42 = vpop.f32.mrf.mxu1  ;;  %v1303_v45 = vsel %vm602_vm10, %v1293_v41, -inf }
 0x561   :  { %1319 = vadd.xlane.f32.xlu0 %v1318_v44  ;;  %1304 = vmax.xlane.f32.xlu1 %v1303_v45  ;;  %v2236_v42 = vld [vmem:[#allocation13 + $0x38] sm:$0xff]   ;;  %v2237_v44 = vld [vmem:[#allocation13 + $0x30] sm:$0xff]   ;;  %v2239_v45 = vld [vmem:[#allocation13 + $0x20] sm:$0xff]  }
 0x562   :  { %v1290_v47 = vpop.f32.mrf.mxu1 }
 0x563   :  { %v2241_v47 = vld [vmem:[#allocation13 + $0x10] sm:$0xff]  }
 0x564   :  { %v2099_v48 = vpop.f32.mrf.mxu1 }
 0x565   :  { %v2242_v48 = vld [vmem:[#allocation13 + $0x8] sm:$0xff]  }
 0x5e2   :  { %v1299_v59 = vpop.xlane.xlu0 %1298 }
 0x5e3   :  { %v1307_v50 = vsub.f32 %v1191_v27, %v1299_v59  ;;  %v2243_v59 = vld [vmem:[#allocation13] sm:$0xff]  }
 0x5e5   :  { %v1312_v51 = vmul.f32 1.442695, %v1307_v50 }
 0x5e6   :  { %v1302_v61 = vpop.xlane.xlu0 %1301 }
 0x5e7   :  { %2263 = vpow2.f32 %v1312_v51  ;;  %v1308_v38 = vsub.f32 %v1242_v32, %v1302_v61 }
 0x5e9   :  { %v1314_v46 = vmul.f32 1.442695, %v1308_v38 }
 0x5ea   :  { %v1305_v55 = vpop.xlane.xlu1 %1304  ;;  %v1320_v63 = vpop.xlane.xlu0 %1319 }
 0x5eb   :  { %2265 = vpow2.f32 %v1314_v46  ;;  %v1309_v56 = vsub.f32 %v1293_v41, %v1305_v55 }
 0x5ed   :  { %v1316_v58 = vmul.f32 1.442695, %v1309_v56 }
 0x5ef   :  { %2267 = vpow2.f32 %v1316_v58 }
 0x5f0   :  { %2269 = vrcp.f32 %v1320_v63 }
 0x5f4   :  { %v2264_v53 = vpop.eup %2263 }
 0x5f5   :  { %v1321_v49 = vsel %vm602_vm10, %v2264_v53, 0.0 }
 0x5f6   :  { %1322 = vadd.xlane.f32.xlu1 %v1321_v49 }
 0x5f8   :  { %v2266_v54 = vpop.eup %2265 }
 0x5f9   :  { %v1324_v57 = vsel %vm602_vm10, %v2266_v54, 0.0 }
 0x5fa   :  { %1325 = vadd.xlane.f32.xlu0 %v1324_v57  ;;  %v1340_v57 = vunpack.c.h.bf16 %v2536_v23 }
 0x5fc   :  { %v2268_v60 = vpop.eup %2267 }
 0x5fd   :  { %v1327_v62 = vsel %vm602_vm10, %v2268_v60, 0.0  ;;  %v2270_v2 = vpop.eup %2269 }
 0x5fe   :  { %v1334_v5 = vmul.f32 %v2270_v2, %v2262_v39 }
 0x607   :  { %1523 = vrot.lane.b32.xlu1 %v2683_v16, %s2440_s0  ;;  %s2453_s0 = smov [#allocation15]  }
 0x608   :  { %s1820_s12 = sshll.u32 %s2453_s0, 4  ;;  %s1821_s12 = int_to_ptr.vmem [resolvable:$true] %s1820_s12 }
 0x609   :  { %s2405_s13 = scalar_lea.vmem %s1821_s12, 256  ;;  %p2410_p3 = scmp.lt.s32.totalorder %s1821_s12, %s1821_s12 }
 0x60a   :  { %p2406_p2 = scmp.ne.s32.totalorder %s1821_s12, %s2405_s13  ;;  %p2411_p4 = scmp.lt.s32.totalorder %s2405_s13, %s2405_s13 }
 0x60c   :  { %p2412_p5 = por %p2411_p4, %p2410_p3 }
 0x60e   :  { %p2413_p6 = pnand %p2412_p5, %p2406_p2 }
 0x610   :  { %1432 = vrot.lane.b32.xlu0 %v2683_v16, %s2451_s5 }
 0x62b   :  { %1328 = vadd.xlane.f32.xlu1 %v1327_v62 }
 0x63c   :  { %1616 = vrot.lane.b32.xlu1 %v2683_v16, %s2452_s6 }
 0x67f   :  { %v1323_v0 = vpop.xlane.xlu1 %1322 }
 0x680   :  { %2271 = vrcp.f32 %v1323_v0 }
 0x683   :  { %v1326_v3 = vpop.xlane.xlu0 %1325  ;;  %v1524_v8 = vpop.permute.xlu1 %1523 }
 0x684   :  { %2273 = vrcp.f32 %v1326_v3 }
 0x687   :  { %v1433_v52 = vpop.permute.xlu0 %1432 }
 0x68d   :  { %v2272_v4 = vpop.eup %2271 }
 0x68e   :  { %v1335_v6 = vmul.f32 %v2272_v4, %v2264_v53 }
 0x690   :  { %v1338_v7 = vpack.c.bf16 %v1335_v6, %v1334_v5 }
 0x691   :  { %v2274_v10 = vpop.eup %2273 }
 0x692   :  { %2103 = vmatmul.mubr.msk.bf16.vlgmr.msra.gmra.mxu0 %vm602_vm10, %v1338_v7  ;;  %v1430_v16 = vrot.slane %v1338_v7, 4  ;;  %v1336_v12 = vmul.f32 %v2274_v10, %v2266_v54 }
 0x693   :  { %2115 = vmatpush3.bf16.msra.mxu0 %v1433_v52  ;;  %2116 = vmatprep.mubr.msk.bf16.mxu0 %vm2450_vm0, %v2449_v1 }
 0x694   :  { %2128 = vmatprep.subr.bf16.mxu0 %v2449_v1 }
 0x69a   :  { %2117 = vmatmul.mubr.msk.bf16.vlgmr.msra.gmra.mxu0 %vm602_vm10, %v1430_v16 }
 0x69b   :  { %2129 = vmatpush3.bf16.msra.mxu0 %v1524_v8  ;;  %2130 = vmatprep.mubr.msk.bf16.mxu0 %vm2450_vm0, %v2449_v1 }
 0x69c   :  { %2142 = vmatprep.subr.bf16.mxu0 %v2449_v1 }
 0x6b4   :  { %v1329_v9 = vpop.xlane.xlu1 %1328 }
 0x6b5   :  { %2275 = vrcp.f32 %v1329_v9 }
 0x6b8   :  { %v1617_v31 = vpop.permute.xlu1 %1616 }
 0x6c2   :  { %v2276_v11 = vpop.eup %2275 }
 0x6c3   :  { %v1337_v13 = vmul.f32 %v2276_v11, %v2268_v60 }
 0x6c5   :  { %v1339_v14 = vpack.c.bf16 %v1337_v13, %v1336_v12 }
 0x6c7   :  { %2131 = vmatmul.mubr.msk.bf16.vlgmr.msra.gmra.mxu0 %vm602_vm10, %v1339_v14  ;;  %v1615_v15 = vrot.slane %v1339_v14, 4 }
 0x6c8   :  { %2143 = vmatpush3.bf16.msra.mxu0 %v1617_v31  ;;  %2144 = vmatprep.mubr.msk.bf16.mxu0 %vm2450_vm0, %v2449_v1 }
 0x6c9   :  { %2156 = vmatprep.subr.bf16.mxu0 %v2449_v1 }
 0x6cf   :  { %2145 = vmatmul.mubr.msk.bf16.vlgmr.msra.gmra.mxu0 %vm602_vm10, %v1615_v15 }
 0x6d0   :  { %2172 = vmatprep.mubr.msk.bf16.mxu0 %vm2450_vm0, %v2449_v1  ;;  %2157 = vmatpush3.bf16.msra.mxu0 %v2236_v42 }
 0x6d1   :  { %2158 = vmatprep.subr.bf16.mxu0 %v2449_v1 }
 0x6d4   :  { %2159 = vmatpush3.bf16.msra.mxu0 %v2237_v44 }
 0x6d5   :  { %2160 = vmatprep.subr.bf16.mxu0 %v2449_v1 }
 0x752   :  { %v1378_v17 = vpop.f32.mrf.mxu0 }
 0x753   :  { %v1384_v19 = vpack.c.bf16 %v1378_v17, %v1378_v17 }
 0x754   :  { %v2104_v21 = vpop.f32.mrf.mxu0 }
 0x755   :  { %2111 = vmatmul.mubr.msk.bf16.vlgmr.msra.gmra.mxu1 %vm400_vm2, %v1384_v19 }
 0x756   :  { %v1381_v43 = vpop.f32.mrf.mxu0  ;;  %2121 = vmatpush3.bf16.msra.mxu1 %v2689_v18  ;;  %2124 = vmatprep.mubr.msk.bf16.mxu1 %vm2450_vm0, %v2449_v1 }
 0x757   :  { %2122 = vmatprep.subr.bf16.mxu1 %v2449_v1 }
 0x758   :  { %v2105_v24 = vpop.f32.mrf.mxu0 }
 0x75a   :  { %v1472_v26 = vpop.f32.mrf.mxu0  ;;  %2123 = vmatpush3.bf16.msra.mxu1 %v2693_v22 }
 0x75b   :  { %v1478_v27 = vpack.c.bf16 %v1472_v26, %v1472_v26  ;;  %2134 = vmatprep.subr.bf16.mxu1 %v2449_v1 }
 0x75c   :  { %v2118_v28 = vpop.f32.mrf.mxu0 }
 0x75d   :  { %2125 = vmatmul.mubr.msk.bf16.vlgmr.msra.gmra.mxu1 %vm400_vm2, %v1478_v27 }
 0x75e   :  { %v1475_v30 = vpop.f32.mrf.mxu0  ;;  %2135 = vmatpush3.bf16.msra.mxu1 %v2699_v25  ;;  %2138 = vmatprep.mubr.msk.bf16.mxu1 %vm2450_vm0, %v2449_v1 }
 0x75f   :  { %2136 = vmatprep.subr.bf16.mxu1 %v2449_v1 }
 0x760   :  { %v2119_v18 = vpop.f32.mrf.mxu0 }
 0x762   :  { %2137 = vmatpush3.bf16.msra.mxu1 %v2704_v29 }
 0x763   :  { %2148 = vmatprep.subr.bf16.mxu1 %v2449_v1 }
 0x787   :  { %v1563_v22 = vpop.f32.mrf.mxu0 }
 0x788   :  { %v1569_v32 = vpack.c.bf16 %v1563_v22, %v1563_v22 }
 0x789   :  { %v2132_v34 = vpop.f32.mrf.mxu0 }
 0x78a   :  { %2139 = vmatmul.mubr.msk.bf16.vlgmr.msra.gmra.mxu1 %vm400_vm2, %v1569_v32 }
 0x78b   :  { %v1566_v35 = vpop.f32.mrf.mxu0  ;;  %2149 = vmatpush3.bf16.msra.mxu1 %v2710_v33  ;;  %2152 = vmatprep.mubr.msk.bf16.mxu1 %vm2450_vm0, %v2449_v1  ;;  %v2238_v33 = vld [vmem:[#allocation13 + $0x28] sm:$0xff]  }
 0x78c   :  { %2150 = vmatprep.subr.bf16.mxu1 %v2449_v1  ;;  %2161 = vmatpush3.bf16.msra.mxu0 %v2238_v33 }
 0x78d   :  { %v2133_v25 = vpop.f32.mrf.mxu0  ;;  %2162 = vmatprep.subr.bf16.mxu0 %v2449_v1 }
 0x78f   :  { %v1656_v36 = vpop.f32.mrf.mxu0  ;;  %2151 = vmatpush3.bf16.msra.mxu1 %v2715_v37  ;;  %v2240_v37 = vld [vmem:[#allocation13 + $0x18] sm:$0xff]  }
 0x790   :  { %v1662_v29 = vpack.c.bf16 %v1656_v36, %v1656_v36  ;;  %2163 = vmatpush3.bf16.msra.mxu0 %v2239_v45 }
 0x791   :  { %v2146_v39 = vpop.f32.mrf.mxu0  ;;  %2164 = vmatprep.subr.bf16.mxu0 %v2449_v1 }
 0x792   :  { %2153 = vmatmul.mubr.msk.bf16.vlgmr.msra.gmra.mxu1 %vm400_vm2, %v1662_v29 }
 0x793   :  { %v1659_v40 = vpop.f32.mrf.mxu0 }
 0x794   :  { %2165 = vmatpush3.bf16.msra.mxu0 %v2240_v37 }
 0x795   :  { %v2147_v41 = vpop.f32.mrf.mxu0  ;;  %2166 = vmatprep.subr.bf16.mxu0 %v2449_v1 }
 0x798   :  { %2167 = vmatpush3.bf16.msra.mxu0 %v2241_v47 }
 0x799   :  { %2168 = vmatprep.subr.bf16.mxu0 %v2449_v1 }
 0x79c   :  { %2169 = vmatpush3.bf16.msra.mxu0 %v2242_v48 }
 0x79d   :  { %2170 = vmatprep.subr.bf16.mxu0 %v2449_v1 }
 0x7a0   :  { %2171 = vmatpush3.bf16.msra.mxu0 %v2243_v59 }
 0x815   :  { %v1422_v50 = vpop.f32.mrf.mxu1 }
 0x816   :  { %v1428_v58 = vadd.f32 %v1422_v50, %v1340_v57 }
 0x817   :  { %v2112_v51 = vpop.f32.mrf.mxu1 }
 0x819   :  { %v1425_v61 = vpop.f32.mrf.mxu1 }
 0x81b   :  { %v2113_v38 = vpop.f32.mrf.mxu1 }
 0x81d   :  { %v1516_v46 = vpop.f32.mrf.mxu1 }
 0x81e   :  { %v1522_v62 = vadd.f32 %v1516_v46, %v1428_v58 }
 0x81f   :  { %v2126_v53 = vpop.f32.mrf.mxu1 }
 0x821   :  { %v1519_v49 = vpop.f32.mrf.mxu1 }
 0x823   :  { %v2127_v54 = vpop.f32.mrf.mxu1 }
 0x84a   :  { %v1607_v55 = vpop.f32.mrf.mxu1 }
 0x84b   :  { %v1613_v0 = vadd.f32 %v1607_v55, %v1522_v62 }
 0x84c   :  { %v2140_v56 = vpop.f32.mrf.mxu1 }
 0x84e   :  { %v1610_v60 = vpop.f32.mrf.mxu1 }
 0x850   :  { %v2141_v63 = vpop.f32.mrf.mxu1 }
 0x852   :  { %v1700_v1 = vpop.f32.mrf.mxu1 }
 0x853   :  { %v1706_v2 = vadd.f32 %v1700_v1, %v1613_v0 }
 0x854   :  { %v2154_v3 = vpop.f32.mrf.mxu1 }
 0x855   :  { %v1707_v4 = vpack.c.bf16 %v1706_v2, %v2753_v20 }
 0x856   :  { %v1703_v5 = vpop.f32.mrf.mxu1 }
 0x857   :  { %2173 = vmatmul.mubr.bf16.vlgmr.msra.gmra.mxu0 %v1707_v4 }
 0x858   :  { %v2155_v6 = vpop.f32.mrf.mxu1 }
 0x917   :  { %v1806_v7 = vpop.f32.mrf.mxu0 }
 0x918   :  { %1813 = vst [vmem:[#allocation15] sm:$0xff] %v1806_v7 }
 0x919   :  { %v2174_v23 = vpop.f32.mrf.mxu0 }
 0x91b   :  { %v1809_v52 = vpop.f32.mrf.mxu0 }
 0x91c   :  { %1814 = vst [vmem:[#allocation15 + $0x8] sm:$0xff] %v1809_v52 }
 0x91d   :  { %v2175_v16 = vpop.f32.mrf.mxu0 }
 0x91e   :  { %2416 = shalt.err (!%p2413_p6)
}
 0x91f   :  { %s2454_s14 = smov 128   ;;  %s2455_s15 = smov 8  }
 0x920   :  { %1826 = dma.vmem_to_hbm [thread:$0]  %s1821_s12, 256, %s2829_s7, [#allocation6], %s2454_s14, %s2454_s14, %s2455_s15  }
 0x921   :  { %2435 = dma.done.wait [#allocation6], 256  }
 0x922   :  { %2436 = vsyncadd [#allocation6], 4294967040 }
 0x923   :  { %1830 = vsyncpa [#allocation5], 1 }
 0x924   :  { %1831 = vsyncpa [#allocation8], 1 }
 0x925   :  { %1832 = vsyncpa [#allocation11], 1 }
 0x926   :  { %1833 = vsyncpa [#allocation14], 1 }
 0x927   :  { %1834 = vsyncpa [#allocation6], 1 }

</bundles_post_ra>
